<compile_context>
chip_gen: v7x
topology: tpu7x:2x2x1
jax: 0.10.0
libtpu: 0.0.40
codegen_flags: <defaults>
</compile_context>

<pallas_src>
import functools
import math

import jax
import jax.numpy as jnp
import numpy as np
from jax.experimental import pallas as pl
from jax.experimental.pallas import tpu as pltpu


# ---------------------------------------------------------------------------
# Pallas kernel: the entire Net forward for one image (one grid step).
# ---------------------------------------------------------------------------
def _lenet_kernel(x_ref, m1_ref, b1_ref, sl1_ref, sr1e_ref, sr1o_ref,
                  m2_ref, b2_ref, sl2_ref, sr2e_ref, sr2o_ref,
                  wf1_ref, bf1_ref, wf2_ref, bf2_ref, wf3_ref, bf3_ref,
                  out_ref):
    dot = functools.partial(jnp.dot, preferred_element_type=jnp.float32)

    x2 = x_ref[0, 0]                                        # (32, 32)

    # conv1 (1->6, 3x3, valid) + bias + relu: 3 banded MXU matmuls.
    a1 = dot(x2[0:30, :], m1_ref[0])
    a1 = a1 + dot(x2[1:31, :], m1_ref[1])
    a1 = a1 + dot(x2[2:32, :], m1_ref[2])
    a1 = jnp.maximum(a1 + b1_ref[...], 0.0)                 # (30, 180) = 6 ch x 30

    # 2x2/2 max pool: pairwise row max, even-row select, even/odd column select.
    v1 = jnp.maximum(a1[0:29, :], a1[1:30, :])              # (29, 180)
    r1 = dot(sl1_ref[...], v1)                              # (15, 180)
    h1 = jnp.maximum(dot(r1, sr1e_ref[...]), dot(r1, sr1o_ref[...]))   # (15, 90)

    # conv2 (6->16, 3x3, valid) + bias + relu.
    a2 = dot(h1[0:13, :], m2_ref[0])
    a2 = a2 + dot(h1[1:14, :], m2_ref[1])
    a2 = a2 + dot(h1[2:15, :], m2_ref[2])
    a2 = jnp.maximum(a2 + b2_ref[...], 0.0)                 # (13, 208) = 16 ch x 13

    v2 = jnp.maximum(a2[0:12, :], a2[1:13, :])              # (12, 208)
    r2 = dot(sl2_ref[...], v2)                              # (6, 208)
    q = jnp.maximum(dot(r2, sr2e_ref[...]), dot(r2, sr2o_ref[...]))    # (6, 96)

    # fc1 (576 -> 120): contract the 6 pooled rows against the re-laid-out
    # weight; this realizes PyTorch's .view(-1, 16*6*6) without any reshape.
    y = bf1_ref[...]                                        # (1, 120)
    for i in range(6):
        y = y + dot(q[i:i + 1, :], wf1_ref[i])
    y = jnp.maximum(y, 0.0)
    y = jnp.maximum(dot(y, wf2_ref[...]) + bf2_ref[...], 0.0)   # (1, 84)
    out_ref[0] = dot(y, wf3_ref[...]) + bf3_ref[...]            # (1, 10)


# ---------------------------------------------------------------------------
# Weight-only preprocessing (pure JAX / numpy layout plumbing, done outside
# the kernel; no activation data moves through these ops).
# ---------------------------------------------------------------------------
def _shift_eye(k, rows, cols):
    """(rows, cols) 0/1 matrix with ones at [ox + k, ox]."""
    e = np.zeros((rows, cols), np.float32)
    e[np.arange(cols) + k, np.arange(cols)] = 1.0
    return e


def _conv_band_matrices(w, in_w, out_w):
    """Banded matrices M[ky] so that  conv_out = sum_ky x[ky:ky+out_h, :] @ M[ky].

    w: (OC, IC, 3, 3).  Input rows are laid out as (H, IC*in_w) channel blocks,
    output rows as (OH, OC*out_w) channel blocks.
    """
    oc, ic = w.shape[0], w.shape[1]
    e = np.stack([_shift_eye(kx, in_w, out_w) for kx in range(3)])   # (3,in_w,out_w)
    m = jnp.einsum("oiyx,xcp->yicop", w, jnp.asarray(e))
    return m.reshape(3, ic * in_w, oc * out_w)


def _pool_matrices(conv_hw, n_ch):
    """Selection matrices for 2x2/2 floor-mode max pooling on channel-blocked rows."""
    p = conv_hw // 2
    sl = np.zeros((p, conv_hw - 1), np.float32)          # picks even rows of pairwise max
    sl[np.arange(p), 2 * np.arange(p)] = 1.0
    sr_e = np.zeros((n_ch * conv_hw, n_ch * p), np.float32)
    sr_o = np.zeros_like(sr_e)
    for c in range(n_ch):
        sr_e[c * conv_hw + 2 * np.arange(p), c * p + np.arange(p)] = 1.0
        sr_o[c * conv_hw + 2 * np.arange(p) + 1, c * p + np.arange(p)] = 1.0
    return jnp.asarray(sl), jnp.asarray(sr_e), jnp.asarray(sr_o)


def net_forward(params, x):
    """x: (B, 1, 32, 32) f32 -> logits (B, 10) f32.  Single fused Pallas kernel."""
    assert x.shape[1:] == (1, 32, 32), x.shape
    B = x.shape[0]
    f32 = jnp.float32
    x = x.astype(f32)

    # conv weights -> banded matmul form; biases repeated per spatial block.
    m1 = _conv_band_matrices(params["conv1_w"].astype(f32), 32, 30)   # (3, 32, 180)
    b1 = jnp.repeat(params["conv1_b"].astype(f32), 30)[None, :]       # (1, 180)
    m2 = _conv_band_matrices(params["conv2_w"].astype(f32), 15, 13)   # (3, 90, 208)
    b2 = jnp.repeat(params["conv2_b"].astype(f32), 13)[None, :]       # (1, 208)
    # pooling selection constants
    sl1, sr1e, sr1o = _pool_matrices(30, 6)    # (15,29), (180,90), (180,90)
    sl2, sr2e, sr2o = _pool_matrices(13, 16)   # (6,12), (208,96), (208,96)
    # fc weights: fc1 re-laid so pooled row i contracts against wf1[i]
    wf1 = (params["fc1_w"].astype(f32)
           .reshape(120, 16, 6, 6).transpose(2, 1, 3, 0).reshape(6, 96, 120))
    bf1 = params["fc1_b"].astype(f32)[None, :]
    wf2 = params["fc2_w"].astype(f32).T        # (120, 84)
    bf2 = params["fc2_b"].astype(f32)[None, :]
    wf3 = params["fc3_w"].astype(f32).T        # (84, 10)
    bf3 = params["fc3_b"].astype(f32)[None, :]

    consts = (m1, b1, sl1, sr1e, sr1o, m2, b2, sl2, sr2e, sr2o,
              wf1, bf1, wf2, bf2, wf3, bf3)

    def whole(a):
        n = a.ndim
        return pl.BlockSpec(a.shape, lambda b: (0,) * n)   # resident, never re-indexed

    out = pl.pallas_call(
        _lenet_kernel,
        out_shape=jax.ShapeDtypeStruct((B, 1, 10), f32),
        grid=(B,),
        in_specs=[pl.BlockSpec((1, 1, 32, 32), lambda b: (b, 0, 0, 0))]
                 + [whole(c) for c in consts],
        out_specs=pl.BlockSpec((1, 1, 10), lambda b: (b, 0, 0)),
        compiler_params=pltpu.CompilerParams(
            dimension_semantics=("parallel",)),
    )(x, *consts)
    return out.reshape(B, 10)


# ---------------------------------------------------------------------------
# Parameter init (PyTorch default shapes; uniform +-1/sqrt(fan_in)).
# ---------------------------------------------------------------------------
def init_params(key):
    def u(k, shape, fan_in):
        bound = 1.0 / math.sqrt(fan_in)
        return jax.random.uniform(k, shape, jnp.float32, -bound, bound)

    ks = jax.random.split(key, 10)
    return {
        "conv1_w": u(ks[0], (6, 1, 3, 3), 1 * 3 * 3),
        "conv1_b": u(ks[1], (6,), 1 * 3 * 3),
        "conv2_w": u(ks[2], (16, 6, 3, 3), 6 * 3 * 3),
        "conv2_b": u(ks[3], (16,), 6 * 3 * 3),
        "fc1_w": u(ks[4], (120, 16 * 6 * 6), 16 * 6 * 6),
        "fc1_b": u(ks[5], (120,), 16 * 6 * 6),
        "fc2_w": u(ks[6], (84, 120), 120),
        "fc2_b": u(ks[7], (84,), 120),
        "fc3_w": u(ks[8], (10, 84), 84),
        "fc3_b": u(ks[9], (10,), 84),
    }


# Pure-JAX reference (same semantics as the PyTorch module) for a sanity check.
def _reference_forward(params, x):
    dn = ("NCHW", "OIHW", "NCHW")
    with jax.default_matmul_precision("highest"):
        y = jax.lax.conv_general_dilated(x, params["conv1_w"], (1, 1), "VALID",
                                         dimension_numbers=dn)
        y = jax.nn.relu(y + params["conv1_b"][None, :, None, None])
        y = jax.lax.reduce_window(y, -jnp.inf, jax.lax.max,
                                  (1, 1, 2, 2), (1, 1, 2, 2), "VALID")
        y = jax.lax.conv_general_dilated(y, params["conv2_w"], (1, 1), "VALID",
                                         dimension_numbers=dn)
        y = jax.nn.relu(y + params["conv2_b"][None, :, None, None])
        y = jax.lax.reduce_window(y, -jnp.inf, jax.lax.max,
                                  (1, 1, 2, 2), (1, 1, 2, 2), "VALID")
        y = y.reshape(y.shape[0], -1)
        y = jax.nn.relu(y @ params["fc1_w"].T + params["fc1_b"])
        y = jax.nn.relu(y @ params["fc2_w"].T + params["fc2_b"])
        return y @ params["fc3_w"].T + params["fc3_b"]


if __name__ == "__main__":
    key = jax.random.PRNGKey(0)
    k_param, k_x = jax.random.split(key)
    params = init_params(k_param)
    # Net requires 32x32 spatial input so that the 16*6*6 flat features line up.
    x = jax.random.normal(k_x, (2, 1, 32, 32), dtype=jnp.float32)

    out = jax.jit(net_forward)(params, x)
    out = jax.block_until_ready(out)
    assert out.shape == (2, 10), out.shape
    assert out.dtype == jnp.float32
    assert bool(jnp.all(jnp.isfinite(out)))

    ref = _reference_forward(params, x)
    np.testing.assert_allclose(np.asarray(out), np.asarray(ref),
                               rtol=2e-2, atol=2e-2)
    print("KERNEL_OK")
</pallas_src>

<mosaic_0001>
module attributes {stable_mosaic.version = 11 : i64} {
  func.func @_lenet_kernel(%arg0: i32, %arg1: memref<1x1x32x32xf32, #tpu.memory_space<vmem>>, %arg2: memref<3x32x180xf32, #tpu.memory_space<vmem>>, %arg3: memref<1x180xf32, #tpu.memory_space<vmem>>, %arg4: memref<15x29xf32, #tpu.memory_space<vmem>>, %arg5: memref<180x90xf32, #tpu.memory_space<vmem>>, %arg6: memref<180x90xf32, #tpu.memory_space<vmem>>, %arg7: memref<3x90x208xf32, #tpu.memory_space<vmem>>, %arg8: memref<1x208xf32, #tpu.memory_space<vmem>>, %arg9: memref<6x12xf32, #tpu.memory_space<vmem>>, %arg10: memref<208x96xf32, #tpu.memory_space<vmem>>, %arg11: memref<208x96xf32, #tpu.memory_space<vmem>>, %arg12: memref<6x96x120xf32, #tpu.memory_space<vmem>>, %arg13: memref<1x120xf32, #tpu.memory_space<vmem>>, %arg14: memref<120x84xf32, #tpu.memory_space<vmem>>, %arg15: memref<1x84xf32, #tpu.memory_space<vmem>>, %arg16: memref<84x10xf32, #tpu.memory_space<vmem>>, %arg17: memref<1x10xf32, #tpu.memory_space<vmem>>, %arg18: memref<1x1x10xf32, #tpu.memory_space<vmem>>) attributes {dimension_semantics = [#tpu.dimension_semantics<parallel>], iteration_bounds = array<i64: 2>, scalar_prefetch = 0 : i64, scratch_operands = 0 : i64, tpu.core_type = #tpu.core_type<tc>, window_params = [{transform_indices = @transform_0, window_bounds = array<i64: 1, 1, 32, 32>}, {pipeline_mode = #tpu.pipeline_mode<synchronous>, transform_indices = @transform_1, window_bounds = array<i64: 3, 32, 180>}, {pipeline_mode = #tpu.pipeline_mode<synchronous>, transform_indices = @transform_2, window_bounds = array<i64: 1, 180>}, {pipeline_mode = #tpu.pipeline_mode<synchronous>, transform_indices = @transform_3, window_bounds = array<i64: 15, 29>}, {pipeline_mode = #tpu.pipeline_mode<synchronous>, transform_indices = @transform_4, window_bounds = array<i64: 180, 90>}, {pipeline_mode = #tpu.pipeline_mode<synchronous>, transform_indices = @transform_5, window_bounds = array<i64: 180, 90>}, {pipeline_mode = #tpu.pipeline_mode<synchronous>, transform_indices = @transform_6, window_bounds = array<i64: 3, 90, 208>}, {pipeline_mode = #tpu.pipeline_mode<synchronous>, transform_indices = @transform_7, window_bounds = array<i64: 1, 208>}, {pipeline_mode = #tpu.pipeline_mode<synchronous>, transform_indices = @transform_8, window_bounds = array<i64: 6, 12>}, {pipeline_mode = #tpu.pipeline_mode<synchronous>, transform_indices = @transform_9, window_bounds = array<i64: 208, 96>}, {pipeline_mode = #tpu.pipeline_mode<synchronous>, transform_indices = @transform_10, window_bounds = array<i64: 208, 96>}, {pipeline_mode = #tpu.pipeline_mode<synchronous>, transform_indices = @transform_11, window_bounds = array<i64: 6, 96, 120>}, {pipeline_mode = #tpu.pipeline_mode<synchronous>, transform_indices = @transform_12, window_bounds = array<i64: 1, 120>}, {pipeline_mode = #tpu.pipeline_mode<synchronous>, transform_indices = @transform_13, window_bounds = array<i64: 120, 84>}, {pipeline_mode = #tpu.pipeline_mode<synchronous>, transform_indices = @transform_14, window_bounds = array<i64: 1, 84>}, {pipeline_mode = #tpu.pipeline_mode<synchronous>, transform_indices = @transform_15, window_bounds = array<i64: 84, 10>}, {pipeline_mode = #tpu.pipeline_mode<synchronous>, transform_indices = @transform_16, window_bounds = array<i64: 1, 10>}, {transform_indices = @transform_17, window_bounds = array<i64: 1, 1, 10>}]} {
    %c0 = arith.constant 0 : index
    %c0_0 = arith.constant 0 : index
    %c0_1 = arith.constant 0 : index
    %c0_2 = arith.constant 0 : index
    %0 = vector.load %arg1[%c0, %c0_0, %c0_1, %c0_2] : memref<1x1x32x32xf32, #tpu.memory_space<vmem>>, vector<1x1x32x32xf32>
    %1 = vector.shape_cast %0 : vector<1x1x32x32xf32> to vector<32x32xf32>
    %2 = vector.extract_strided_slice %1 {offsets = [0, 0], sizes = [30, 32], strides = [1, 1]} : vector<32x32xf32> to vector<30x32xf32>
    %c0_3 = arith.constant 0 : index
    %c0_4 = arith.constant 0 : index
    %c0_5 = arith.constant 0 : index
    %3 = vector.load %arg2[%c0_3, %c0_4, %c0_5] : memref<3x32x180xf32, #tpu.memory_space<vmem>>, vector<1x32x180xf32>
    %4 = vector.shape_cast %3 : vector<1x32x180xf32> to vector<32x180xf32>
    %cst = arith.constant dense<0.000000e+00> : vector<30x180xf32>
    %5 = tpu.matmul %2, %4, %cst {dimension_numbers = #tpu.dot_dimension_numbers<[1], [0], [0], [1], [0, 0, 1, 1], [], []>} : vector<30x32xf32>, vector<32x180xf32>, vector<30x180xf32> -> vector<30x180xf32>
    %6 = vector.extract_strided_slice %1 {offsets = [1, 0], sizes = [30, 32], strides = [1, 1]} : vector<32x32xf32> to vector<30x32xf32>
    %c1 = arith.constant 1 : index
    %c0_6 = arith.constant 0 : index
    %c0_7 = arith.constant 0 : index
    %7 = vector.load %arg2[%c1, %c0_6, %c0_7] : memref<3x32x180xf32, #tpu.memory_space<vmem>>, vector<1x32x180xf32>
    %8 = vector.shape_cast %7 : vector<1x32x180xf32> to vector<32x180xf32>
    %cst_8 = arith.constant dense<0.000000e+00> : vector<30x180xf32>
    %9 = tpu.matmul %6, %8, %cst_8 {dimension_numbers = #tpu.dot_dimension_numbers<[1], [0], [0], [1], [0, 0, 1, 1], [], []>} : vector<30x32xf32>, vector<32x180xf32>, vector<30x180xf32> -> vector<30x180xf32>
    %10 = arith.addf %5, %9 : vector<30x180xf32>
    %11 = vector.extract_strided_slice %1 {offsets = [2, 0], sizes = [30, 32], strides = [1, 1]} : vector<32x32xf32> to vector<30x32xf32>
    %c2 = arith.constant 2 : index
    %c0_9 = arith.constant 0 : index
    %c0_10 = arith.constant 0 : index
    %12 = vector.load %arg2[%c2, %c0_9, %c0_10] : memref<3x32x180xf32, #tpu.memory_space<vmem>>, vector<1x32x180xf32>
    %13 = vector.shape_cast %12 : vector<1x32x180xf32> to vector<32x180xf32>
    %cst_11 = arith.constant dense<0.000000e+00> : vector<30x180xf32>
    %14 = tpu.matmul %11, %13, %cst_11 {dimension_numbers = #tpu.dot_dimension_numbers<[1], [0], [0], [1], [0, 0, 1, 1], [], []>} : vector<30x32xf32>, vector<32x180xf32>, vector<30x180xf32> -> vector<30x180xf32>
    %15 = arith.addf %10, %14 : vector<30x180xf32>
    %c0_12 = arith.constant 0 : index
    %c0_13 = arith.constant 0 : index
    %16 = vector.load %arg3[%c0_12, %c0_13] : memref<1x180xf32, #tpu.memory_space<vmem>>, vector<1x180xf32>
    %17 = vector.broadcast %16 : vector<1x180xf32> to vector<30x180xf32>
    %18 = arith.addf %15, %17 : vector<30x180xf32>
    %cst_14 = arith.constant 0.000000e+00 : f32
    %19 = vector.broadcast %cst_14 : f32 to vector<30x180xf32>
    %20 = arith.maximumf %18, %19 : vector<30x180xf32>
    %21 = vector.extract_strided_slice %20 {offsets = [0, 0], sizes = [29, 180], strides = [1, 1]} : vector<30x180xf32> to vector<29x180xf32>
    %22 = vector.extract_strided_slice %20 {offsets = [1, 0], sizes = [29, 180], strides = [1, 1]} : vector<30x180xf32> to vector<29x180xf32>
    %23 = arith.maximumf %21, %22 : vector<29x180xf32>
    %c0_15 = arith.constant 0 : index
    %c0_16 = arith.constant 0 : index
    %24 = vector.load %arg4[%c0_15, %c0_16] : memref<15x29xf32, #tpu.memory_space<vmem>>, vector<15x29xf32>
    %cst_17 = arith.constant dense<0.000000e+00> : vector<15x180xf32>
    %25 = tpu.matmul %24, %23, %cst_17 {dimension_numbers = #tpu.dot_dimension_numbers<[1], [0], [0], [1], [0, 0, 1, 1], [], []>} : vector<15x29xf32>, vector<29x180xf32>, vector<15x180xf32> -> vector<15x180xf32>
    %c0_18 = arith.constant 0 : index
    %c0_19 = arith.constant 0 : index
    %26 = vector.load %arg5[%c0_18, %c0_19] : memref<180x90xf32, #tpu.memory_space<vmem>>, vector<180x90xf32>
    %cst_20 = arith.constant dense<0.000000e+00> : vector<15x90xf32>
    %27 = tpu.matmul %25, %26, %cst_20 {dimension_numbers = #tpu.dot_dimension_numbers<[1], [0], [0], [1], [0, 0, 1, 1], [], []>} : vector<15x180xf32>, vector<180x90xf32>, vector<15x90xf32> -> vector<15x90xf32>
    %c0_21 = arith.constant 0 : index
    %c0_22 = arith.constant 0 : index
    %28 = vector.load %arg6[%c0_21, %c0_22] : memref<180x90xf32, #tpu.memory_space<vmem>>, vector<180x90xf32>
    %cst_23 = arith.constant dense<0.000000e+00> : vector<15x90xf32>
    %29 = tpu.matmul %25, %28, %cst_23 {dimension_numbers = #tpu.dot_dimension_numbers<[1], [0], [0], [1], [0, 0, 1, 1], [], []>} : vector<15x180xf32>, vector<180x90xf32>, vector<15x90xf32> -> vector<15x90xf32>
    %30 = arith.maximumf %27, %29 : vector<15x90xf32>
    %31 = vector.extract_strided_slice %30 {offsets = [0, 0], sizes = [13, 90], strides = [1, 1]} : vector<15x90xf32> to vector<13x90xf32>
    %c0_24 = arith.constant 0 : index
    %c0_25 = arith.constant 0 : index
    %c0_26 = arith.constant 0 : index
    %32 = vector.load %arg7[%c0_24, %c0_25, %c0_26] : memref<3x90x208xf32, #tpu.memory_space<vmem>>, vector<1x90x208xf32>
    %33 = vector.shape_cast %32 : vector<1x90x208xf32> to vector<90x208xf32>
    %cst_27 = arith.constant dense<0.000000e+00> : vector<13x208xf32>
    %34 = tpu.matmul %31, %33, %cst_27 {dimension_numbers = #tpu.dot_dimension_numbers<[1], [0], [0], [1], [0, 0, 1, 1], [], []>} : vector<13x90xf32>, vector<90x208xf32>, vector<13x208xf32> -> vector<13x208xf32>
    %35 = vector.extract_strided_slice %30 {offsets = [1, 0], sizes = [13, 90], strides = [1, 1]} : vector<15x90xf32> to vector<13x90xf32>
    %c1_28 = arith.constant 1 : index
    %c0_29 = arith.constant 0 : index
    %c0_30 = arith.constant 0 : index
    %36 = vector.load %arg7[%c1_28, %c0_29, %c0_30] : memref<3x90x208xf32, #tpu.memory_space<vmem>>, vector<1x90x208xf32>
    %37 = vector.shape_cast %36 : vector<1x90x208xf32> to vector<90x208xf32>
    %cst_31 = arith.constant dense<0.000000e+00> : vector<13x208xf32>
    %38 = tpu.matmul %35, %37, %cst_31 {dimension_numbers = #tpu.dot_dimension_numbers<[1], [0], [0], [1], [0, 0, 1, 1], [], []>} : vector<13x90xf32>, vector<90x208xf32>, vector<13x208xf32> -> vector<13x208xf32>
    %39 = arith.addf %34, %38 : vector<13x208xf32>
    %40 = vector.extract_strided_slice %30 {offsets = [2, 0], sizes = [13, 90], strides = [1, 1]} : vector<15x90xf32> to vector<13x90xf32>
    %c2_32 = arith.constant 2 : index
    %c0_33 = arith.constant 0 : index
    %c0_34 = arith.constant 0 : index
    %41 = vector.load %arg7[%c2_32, %c0_33, %c0_34] : memref<3x90x208xf32, #tpu.memory_space<vmem>>, vector<1x90x208xf32>
    %42 = vector.shape_cast %41 : vector<1x90x208xf32> to vector<90x208xf32>
    %cst_35 = arith.constant dense<0.000000e+00> : vector<13x208xf32>
    %43 = tpu.matmul %40, %42, %cst_35 {dimension_numbers = #tpu.dot_dimension_numbers<[1], [0], [0], [1], [0, 0, 1, 1], [], []>} : vector<13x90xf32>, vector<90x208xf32>, vector<13x208xf32> -> vector<13x208xf32>
    %44 = arith.addf %39, %43 : vector<13x208xf32>
    %c0_36 = arith.constant 0 : index
    %c0_37 = arith.constant 0 : index
    %45 = vector.load %arg8[%c0_36, %c0_37] : memref<1x208xf32, #tpu.memory_space<vmem>>, vector<1x208xf32>
    %46 = vector.broadcast %45 : vector<1x208xf32> to vector<13x208xf32>
    %47 = arith.addf %44, %46 : vector<13x208xf32>
    %cst_38 = arith.constant 0.000000e+00 : f32
    %48 = vector.broadcast %cst_38 : f32 to vector<13x208xf32>
    %49 = arith.maximumf %47, %48 : vector<13x208xf32>
    %50 = vector.extract_strided_slice %49 {offsets = [0, 0], sizes = [12, 208], strides = [1, 1]} : vector<13x208xf32> to vector<12x208xf32>
    %51 = vector.extract_strided_slice %49 {offsets = [1, 0], sizes = [12, 208], strides = [1, 1]} : vector<13x208xf32> to vector<12x208xf32>
    %52 = arith.maximumf %50, %51 : vector<12x208xf32>
    %c0_39 = arith.constant 0 : index
    %c0_40 = arith.constant 0 : index
    %53 = vector.load %arg9[%c0_39, %c0_40] : memref<6x12xf32, #tpu.memory_space<vmem>>, vector<6x12xf32>
    %cst_41 = arith.constant dense<0.000000e+00> : vector<6x208xf32>
    %54 = tpu.matmul %53, %52, %cst_41 {dimension_numbers = #tpu.dot_dimension_numbers<[1], [0], [0], [1], [0, 0, 1, 1], [], []>} : vector<6x12xf32>, vector<12x208xf32>, vector<6x208xf32> -> vector<6x208xf32>
    %c0_42 = arith.constant 0 : index
    %c0_43 = arith.constant 0 : index
    %55 = vector.load %arg10[%c0_42, %c0_43] : memref<208x96xf32, #tpu.memory_space<vmem>>, vector<208x96xf32>
    %cst_44 = arith.constant dense<0.000000e+00> : vector<6x96xf32>
    %56 = tpu.matmul %54, %55, %cst_44 {dimension_numbers = #tpu.dot_dimension_numbers<[1], [0], [0], [1], [0, 0, 1, 1], [], []>} : vector<6x208xf32>, vector<208x96xf32>, vector<6x96xf32> -> vector<6x96xf32>
    %c0_45 = arith.constant 0 : index
    %c0_46 = arith.constant 0 : index
    %57 = vector.load %arg11[%c0_45, %c0_46] : memref<208x96xf32, #tpu.memory_space<vmem>>, vector<208x96xf32>
    %cst_47 = arith.constant dense<0.000000e+00> : vector<6x96xf32>
    %58 = tpu.matmul %54, %57, %cst_47 {dimension_numbers = #tpu.dot_dimension_numbers<[1], [0], [0], [1], [0, 0, 1, 1], [], []>} : vector<6x208xf32>, vector<208x96xf32>, vector<6x96xf32> -> vector<6x96xf32>
    %59 = arith.maximumf %56, %58 : vector<6x96xf32>
    %c0_48 = arith.constant 0 : index
    %c0_49 = arith.constant 0 : index
    %60 = vector.load %arg13[%c0_48, %c0_49] : memref<1x120xf32, #tpu.memory_space<vmem>>, vector<1x120xf32>
    %61 = vector.extract_strided_slice %59 {offsets = [0, 0], sizes = [1, 96], strides = [1, 1]} : vector<6x96xf32> to vector<1x96xf32>
    %c0_50 = arith.constant 0 : index
    %c0_51 = arith.constant 0 : index
    %c0_52 = arith.constant 0 : index
    %62 = vector.load %arg12[%c0_50, %c0_51, %c0_52] : memref<6x96x120xf32, #tpu.memory_space<vmem>>, vector<1x96x120xf32>
    %63 = vector.shape_cast %62 : vector<1x96x120xf32> to vector<96x120xf32>
    %cst_53 = arith.constant dense<0.000000e+00> : vector<1x120xf32>
    %64 = tpu.matmul %61, %63, %cst_53 {dimension_numbers = #tpu.dot_dimension_numbers<[1], [0], [0], [1], [0, 0, 1, 1], [], []>} : vector<1x96xf32>, vector<96x120xf32>, vector<1x120xf32> -> vector<1x120xf32>
    %65 = arith.addf %60, %64 : vector<1x120xf32>
    %66 = vector.extract_strided_slice %59 {offsets = [1, 0], sizes = [1, 96], strides = [1, 1]} : vector<6x96xf32> to vector<1x96xf32>
    %c1_54 = arith.constant 1 : index
    %c0_55 = arith.constant 0 : index
    %c0_56 = arith.constant 0 : index
    %67 = vector.load %arg12[%c1_54, %c0_55, %c0_56] : memref<6x96x120xf32, #tpu.memory_space<vmem>>, vector<1x96x120xf32>
    %68 = vector.shape_cast %67 : vector<1x96x120xf32> to vector<96x120xf32>
    %cst_57 = arith.constant dense<0.000000e+00> : vector<1x120xf32>
    %69 = tpu.matmul %66, %68, %cst_57 {dimension_numbers = #tpu.dot_dimension_numbers<[1], [0], [0], [1], [0, 0, 1, 1], [], []>} : vector<1x96xf32>, vector<96x120xf32>, vector<1x120xf32> -> vector<1x120xf32>
    %70 = arith.addf %65, %69 : vector<1x120xf32>
    %71 = vector.extract_strided_slice %59 {offsets = [2, 0], sizes = [1, 96], strides = [1, 1]} : vector<6x96xf32> to vector<1x96xf32>
    %c2_58 = arith.constant 2 : index
    %c0_59 = arith.constant 0 : index
    %c0_60 = arith.constant 0 : index
    %72 = vector.load %arg12[%c2_58, %c0_59, %c0_60] : memref<6x96x120xf32, #tpu.memory_space<vmem>>, vector<1x96x120xf32>
    %73 = vector.shape_cast %72 : vector<1x96x120xf32> to vector<96x120xf32>
    %cst_61 = arith.constant dense<0.000000e+00> : vector<1x120xf32>
    %74 = tpu.matmul %71, %73, %cst_61 {dimension_numbers = #tpu.dot_dimension_numbers<[1], [0], [0], [1], [0, 0, 1, 1], [], []>} : vector<1x96xf32>, vector<96x120xf32>, vector<1x120xf32> -> vector<1x120xf32>
    %75 = arith.addf %70, %74 : vector<1x120xf32>
    %76 = vector.extract_strided_slice %59 {offsets = [3, 0], sizes = [1, 96], strides = [1, 1]} : vector<6x96xf32> to vector<1x96xf32>
    %c3 = arith.constant 3 : index
    %c0_62 = arith.constant 0 : index
    %c0_63 = arith.constant 0 : index
    %77 = vector.load %arg12[%c3, %c0_62, %c0_63] : memref<6x96x120xf32, #tpu.memory_space<vmem>>, vector<1x96x120xf32>
    %78 = vector.shape_cast %77 : vector<1x96x120xf32> to vector<96x120xf32>
    %cst_64 = arith.constant dense<0.000000e+00> : vector<1x120xf32>
    %79 = tpu.matmul %76, %78, %cst_64 {dimension_numbers = #tpu.dot_dimension_numbers<[1], [0], [0], [1], [0, 0, 1, 1], [], []>} : vector<1x96xf32>, vector<96x120xf32>, vector<1x120xf32> -> vector<1x120xf32>
    %80 = arith.addf %75, %79 : vector<1x120xf32>
    %81 = vector.extract_strided_slice %59 {offsets = [4, 0], sizes = [1, 96], strides = [1, 1]} : vector<6x96xf32> to vector<1x96xf32>
    %c4 = arith.constant 4 : index
    %c0_65 = arith.constant 0 : index
    %c0_66 = arith.constant 0 : index
    %82 = vector.load %arg12[%c4, %c0_65, %c0_66] : memref<6x96x120xf32, #tpu.memory_space<vmem>>, vector<1x96x120xf32>
    %83 = vector.shape_cast %82 : vector<1x96x120xf32> to vector<96x120xf32>
    %cst_67 = arith.constant dense<0.000000e+00> : vector<1x120xf32>
    %84 = tpu.matmul %81, %83, %cst_67 {dimension_numbers = #tpu.dot_dimension_numbers<[1], [0], [0], [1], [0, 0, 1, 1], [], []>} : vector<1x96xf32>, vector<96x120xf32>, vector<1x120xf32> -> vector<1x120xf32>
    %85 = arith.addf %80, %84 : vector<1x120xf32>
    %86 = vector.extract_strided_slice %59 {offsets = [5, 0], sizes = [1, 96], strides = [1, 1]} : vector<6x96xf32> to vector<1x96xf32>
    %c5 = arith.constant 5 : index
    %c0_68 = arith.constant 0 : index
    %c0_69 = arith.constant 0 : index
    %87 = vector.load %arg12[%c5, %c0_68, %c0_69] : memref<6x96x120xf32, #tpu.memory_space<vmem>>, vector<1x96x120xf32>
    %88 = vector.shape_cast %87 : vector<1x96x120xf32> to vector<96x120xf32>
    %cst_70 = arith.constant dense<0.000000e+00> : vector<1x120xf32>
    %89 = tpu.matmul %86, %88, %cst_70 {dimension_numbers = #tpu.dot_dimension_numbers<[1], [0], [0], [1], [0, 0, 1, 1], [], []>} : vector<1x96xf32>, vector<96x120xf32>, vector<1x120xf32> -> vector<1x120xf32>
    %90 = arith.addf %85, %89 : vector<1x120xf32>
    %cst_71 = arith.constant 0.000000e+00 : f32
    %91 = vector.broadcast %cst_71 : f32 to vector<1x120xf32>
    %92 = arith.maximumf %90, %91 : vector<1x120xf32>
    %c0_72 = arith.constant 0 : index
    %c0_73 = arith.constant 0 : index
    %93 = vector.load %arg14[%c0_72, %c0_73] : memref<120x84xf32, #tpu.memory_space<vmem>>, vector<120x84xf32>
    %cst_74 = arith.constant dense<0.000000e+00> : vector<1x84xf32>
    %94 = tpu.matmul %92, %93, %cst_74 {dimension_numbers = #tpu.dot_dimension_numbers<[1], [0], [0], [1], [0, 0, 1, 1], [], []>} : vector<1x120xf32>, vector<120x84xf32>, vector<1x84xf32> -> vector<1x84xf32>
    %c0_75 = arith.constant 0 : index
    %c0_76 = arith.constant 0 : index
    %95 = vector.load %arg15[%c0_75, %c0_76] : memref<1x84xf32, #tpu.memory_space<vmem>>, vector<1x84xf32>
    %96 = arith.addf %94, %95 : vector<1x84xf32>
    %cst_77 = arith.constant 0.000000e+00 : f32
    %97 = vector.broadcast %cst_77 : f32 to vector<1x84xf32>
    %98 = arith.maximumf %96, %97 : vector<1x84xf32>
    %c0_78 = arith.constant 0 : index
    %c0_79 = arith.constant 0 : index
    %99 = vector.load %arg16[%c0_78, %c0_79] : memref<84x10xf32, #tpu.memory_space<vmem>>, vector<84x10xf32>
    %cst_80 = arith.constant dense<0.000000e+00> : vector<1x10xf32>
    %100 = tpu.matmul %98, %99, %cst_80 {dimension_numbers = #tpu.dot_dimension_numbers<[1], [0], [0], [1], [0, 0, 1, 1], [], []>} : vector<1x84xf32>, vector<84x10xf32>, vector<1x10xf32> -> vector<1x10xf32>
    %c0_81 = arith.constant 0 : index
    %c0_82 = arith.constant 0 : index
    %101 = vector.load %arg17[%c0_81, %c0_82] : memref<1x10xf32, #tpu.memory_space<vmem>>, vector<1x10xf32>
    %102 = arith.addf %100, %101 : vector<1x10xf32>
    %c0_83 = arith.constant 0 : index
    %c0_84 = arith.constant 0 : index
    %c0_85 = arith.constant 0 : index
    %103 = vector.load %arg18[%c0_83, %c0_84, %c0_85] : memref<1x1x10xf32, #tpu.memory_space<vmem>>, vector<1x1x10xf32>
    %104 = vector.shape_cast %103 : vector<1x1x10xf32> to vector<1x10xf32>
    %105 = vector.shape_cast %102 : vector<1x10xf32> to vector<1x1x10xf32>
    tpu.vector_store %arg18[%c0_83, %c0_84, %c0_85], %105 {strides = array<i32>} : memref<1x1x10xf32, #tpu.memory_space<vmem>>, vector<1x1x10xf32>,
    return
  }
  func.func @transform_0(%arg0: i32) -> (i32, i32, i32, i32) {
    %c0_i32 = arith.constant 0 : i32
    %c0_i32_0 = arith.constant 0 : i32
    %c0_i32_1 = arith.constant 0 : i32
    %c0_i32_2 = arith.constant 0 : i32
    return %arg0, %c0_i32, %c0_i32_0, %c0_i32_1 : i32, i32, i32, i32
  }
  func.func @transform_1(%arg0: i32) -> (i32, i32, i32) {
    %c0_i32 = arith.constant 0 : i32
    %c0_i32_0 = arith.constant 0 : i32
    %c0_i32_1 = arith.constant 0 : i32
    %c0_i32_2 = arith.constant 0 : i32
    return %c0_i32, %c0_i32_0, %c0_i32_1 : i32, i32, i32
  }
  func.func @transform_2(%arg0: i32) -> (i32, i32) {
    %c0_i32 = arith.constant 0 : i32
    %c0_i32_0 = arith.constant 0 : i32
    %c0_i32_1 = arith.constant 0 : i32
    return %c0_i32, %c0_i32_0 : i32, i32
  }
  func.func @transform_3(%arg0: i32) -> (i32, i32) {
    %c0_i32 = arith.constant 0 : i32
    %c0_i32_0 = arith.constant 0 : i32
    %c0_i32_1 = arith.constant 0 : i32
    return %c0_i32, %c0_i32_0 : i32, i32
  }
  func.func @transform_4(%arg0: i32) -> (i32, i32) {
    %c0_i32 = arith.constant 0 : i32
    %c0_i32_0 = arith.constant 0 : i32
    %c0_i32_1 = arith.constant 0 : i32
    return %c0_i32, %c0_i32_0 : i32, i32
  }
  func.func @transform_5(%arg0: i32) -> (i32, i32) {
    %c0_i32 = arith.constant 0 : i32
    %c0_i32_0 = arith.constant 0 : i32
    %c0_i32_1 = arith.constant 0 : i32
    return %c0_i32, %c0_i32_0 : i32, i32
  }
  func.func @transform_6(%arg0: i32) -> (i32, i32, i32) {
    %c0_i32 = arith.constant 0 : i32
    %c0_i32_0 = arith.constant 0 : i32
    %c0_i32_1 = arith.constant 0 : i32
    %c0_i32_2 = arith.constant 0 : i32
    return %c0_i32, %c0_i32_0, %c0_i32_1 : i32, i32, i32
  }
  func.func @transform_7(%arg0: i32) -> (i32, i32) {
    %c0_i32 = arith.constant 0 : i32
    %c0_i32_0 = arith.constant 0 : i32
    %c0_i32_1 = arith.constant 0 : i32
    return %c0_i32, %c0_i32_0 : i32, i32
  }
  func.func @transform_8(%arg0: i32) -> (i32, i32) {
    %c0_i32 = arith.constant 0 : i32
    %c0_i32_0 = arith.constant 0 : i32
    %c0_i32_1 = arith.constant 0 : i32
    return %c0_i32, %c0_i32_0 : i32, i32
  }
  func.func @transform_9(%arg0: i32) -> (i32, i32) {
    %c0_i32 = arith.constant 0 : i32
    %c0_i32_0 = arith.constant 0 : i32
    %c0_i32_1 = arith.constant 0 : i32
    return %c0_i32, %c0_i32_0 : i32, i32
  }
  func.func @transform_10(%arg0: i32) -> (i32, i32) {
    %c0_i32 = arith.constant 0 : i32
    %c0_i32_0 = arith.constant 0 : i32
    %c0_i32_1 = arith.constant 0 : i32
    return %c0_i32, %c0_i32_0 : i32, i32
  }
  func.func @transform_11(%arg0: i32) -> (i32, i32, i32) {
    %c0_i32 = arith.constant 0 : i32
    %c0_i32_0 = arith.constant 0 : i32
    %c0_i32_1 = arith.constant 0 : i32
    %c0_i32_2 = arith.constant 0 : i32
    return %c0_i32, %c0_i32_0, %c0_i32_1 : i32, i32, i32
  }
  func.func @transform_12(%arg0: i32) -> (i32, i32) {
    %c0_i32 = arith.constant 0 : i32
    %c0_i32_0 = arith.constant 0 : i32
    %c0_i32_1 = arith.constant 0 : i32
    return %c0_i32, %c0_i32_0 : i32, i32
  }
  func.func @transform_13(%arg0: i32) -> (i32, i32) {
    %c0_i32 = arith.constant 0 : i32
    %c0_i32_0 = arith.constant 0 : i32
    %c0_i32_1 = arith.constant 0 : i32
    return %c0_i32, %c0_i32_0 : i32, i32
  }
  func.func @transform_14(%arg0: i32) -> (i32, i32) {
    %c0_i32 = arith.constant 0 : i32
    %c0_i32_0 = arith.constant 0 : i32
    %c0_i32_1 = arith.constant 0 : i32
    return %c0_i32, %c0_i32_0 : i32, i32
  }
  func.func @transform_15(%arg0: i32) -> (i32, i32) {
    %c0_i32 = arith.constant 0 : i32
    %c0_i32_0 = arith.constant 0 : i32
    %c0_i32_1 = arith.constant 0 : i32
    return %c0_i32, %c0_i32_0 : i32, i32
  }
  func.func @transform_16(%arg0: i32) -> (i32, i32) {
    %c0_i32 = arith.constant 0 : i32
    %c0_i32_0 = arith.constant 0 : i32
    %c0_i32_1 = arith.constant 0 : i32
    return %c0_i32, %c0_i32_0 : i32, i32
  }
  func.func @transform_17(%arg0: i32) -> (i32, i32, i32) {
    %c0_i32 = arith.constant 0 : i32
    %c0_i32_0 = arith.constant 0 : i32
    %c0_i32_1 = arith.constant 0 : i32
    return %arg0, %c0_i32, %c0_i32_0 : i32, i32, i32
  }
}

</mosaic_0001>

<bundles_post_ra>
// kernel: net_forward.1
= control target key start
LH: loop header
LB: loop body
LE: loop exit
PB: predicated region body
PF: predicated region fallthrough
CT: control target
= control target key end

     0   :  { %s5112_s0 = inlined_call_operand.vmem [shape: f32[2,1,32,32], index: 0, kind: input, shape index: {}]   ;;  %s5113_s1 = inlined_call_operand.vmem [shape: f32[3,32,180], index: 1, kind: input, shape index: {}]   ;;  %s5114_s2 = inlined_call_operand.vmem [shape: f32[1,180], index: 2, kind: input, shape index: {}]   ;;  %s5115_s3 = inlined_call_operand.vmem [shape: f32[15,29], index: 3, kind: input, shape index: {}]   ;;  %s5116_s4 = inlined_call_operand.vmem [shape: f32[180,90], index: 4, kind: input, shape index: {}]   ;;  %s5117_s5 = inlined_call_operand.vmem [shape: f32[180,90], index: 5, kind: input, shape index: {}]   ;;  %s5118_s6 = inlined_call_operand.vmem [shape: f32[3,90,208], index: 6, kind: input, shape index: {}]   ;;  %s5119_s7 = inlined_call_operand.vmem [shape: f32[1,208], index: 7, kind: input, shape index: {}]   ;;  %s5120_s8 = inlined_call_operand.vmem [shape: f32[6,12], index: 8, kind: input, shape index: {}]   ;;  %s5121_s9 = inlined_call_operand.vmem [shape: f32[208,96], index: 9, kind: input, shape index: {}]   ;;  %s5122_s10 = inlined_call_operand.vmem [shape: f32[208,96], index: 10, kind: input, shape index: {}]   ;;  %s5123_s11 = inlined_call_operand.vmem [shape: f32[6,96,120], index: 11, kind: input, shape index: {}]   ;;  %s5124_s12 = inlined_call_operand.vmem [shape: f32[1,120], index: 12, kind: input, shape index: {}]   ;;  %s5125_s13 = inlined_call_operand.vmem [shape: f32[120,84], index: 13, kind: input, shape index: {}]   ;;  %s5126_s14 = inlined_call_operand.vmem [shape: f32[1,84], index: 14, kind: input, shape index: {}]   ;;  %s5127_s15 = inlined_call_operand.vmem [shape: f32[84,10], index: 15, kind: input, shape index: {}]   ;;  %s5128_s16 = inlined_call_operand.vmem [shape: f32[1,10], index: 16, kind: input, shape index: {}]   ;;  %s5129_s17 = inlined_call_operand.hbm [shape: f32[2,1,10], index: 17, kind: output, shape index: {}]  }
   0x1   :  { %5138 = sst [smem:[#allocation11_spill]] %s5112_s0 }
   0x2   :  { %5139 = sst [smem:[#allocation12_spill]] %s5113_s1 }
   0x3   :  { %5140 = sst [smem:[#allocation13_spill]] %s5128_s16 }
   0x4   :  { %5141 = sst [smem:[#allocation14_spill]] %s5129_s17 }
   0x5   :  { %22 = vsyncpa [#allocation3], 0 }
   0x6   :  { %24 = vsyncpa [#allocation3 + $0x1], 0  ;;  %s3861_s24 = smov 0   ;;  %s3863_s25 = smov 0  }
   0x7   :  { %s3865_s26 = smov 0   ;;  %s3867_s27 = smov 0  }
   0x8 LB: > { %5142 = sst [smem:[#allocation5_spill]] %s3752_s24  ;;  %s3882_s28 = sadd.s32 4294967295, %s3764_s27   ;;  %s3764_s27 = sphi %s3867_s27, %s5159_s27   ;;  %s3760_s26 = sphi %s3865_s26, %s5161_s26   ;;  %s3756_s25 = sphi %s3863_s25, %s5163_s25   ;;  %s3752_s24 = sphi %s3861_s24, %s5162_s24  }
   0x9   : > { %5143 = sst [smem:[#allocation6_spill]] %s3760_s26  ;;  %s2707_s29 = sadd.s32 4294967294, %s3764_s27  }
   0xa   : > { %5144 = sst [smem:[#allocation7_spill]] %s3764_s27  ;;  %s3886_s0 = sadd.s32 1, %s3764_s27  }
   0xb   : > { %5145 = sst [smem:[#allocation8_spill]] %s3886_s0  ;;  %s399_s30 = sadd.s32 1, %s3760_s26 }
   0xc   : > { %s396_s18 = ssub.s32 %s3764_s27, %s3886_s0  ;;  %p409_p0 = scmp.ne.s32.totalorder %s3760_s26, %s3756_s25 }
   0xd   : > { %p397_p1 = scmp.eq.s32.totalorder %s396_s18, 0  ;;  %p410_p2 = scmp.eq.s32.totalorder %s3882_s28, 1 }
   0xe   : > { %p415_p3 = scmp.ne.s32.totalorder %s3756_s25, %s3752_s24  ;;  %p416_p4 = scmp.eq.s32.totalorder %s2707_s29, 1 }
   0xf   : > { %s3897_s19 = scalar_select %p397_p1, %s3760_s26, %s399_s30  }
  0x10   : > { %p3899_p5 = por %p410_p2, %p409_p0  ;;  %p3903_p6 = por %p416_p4, %p415_p3 }
  0x11   : > { %5146 = sst [smem:[#allocation9_spill]] %s3897_s19  ;;  %p2710_p7 = scmp.ge.s32.totalorder %s3764_s27, 1 }
  0x12   : > { %s5148_s20 = scalar_select %p3903_p6, 1, 0 }
  0x13   : > { %p490_p8 = scmp.lt.s32.totalorder %s3764_s27, 3 }
  0x14   : > { %5149 = sst [smem:[#allocation10_spill]] %s5148_s20 }
  0x15   : > { %p491_p9 = pnand %p2710_p7, %p490_p8 }
  0x16   : > { %s5150_s23 = sld [smem:[#allocation12_spill]] (!%p491_p9)  ;;  %p541_p10 = scmp.lt.s32.totalorder (!%p491_p9), %s3882_s28, 1  ;;  %v3766_v7 = vmov (!%p491_p9), 0.0   ;;  %vm571_vm0 = vcmask (!%p491_p9), 1046528   ;;  %vm579_vm1 = vcmask (!%p491_p9), 261120   ;;  %vm783_vm2 = vcmask (!%p491_p9), 1045504  }
  0x17   : > { %494 = sbr.rel (%p491_p9) target bundleno = 2206 (0x89e), region = 88  ;;  %652 = vmatprep.mubr.f32.mxu0 (!%p491_p9), %v3766_v7  ;;  %664 = vmatprep.mubr.f32.mxu1 (!%p491_p9), %v3766_v7  ;;  %s5151_s27 = sld [smem:[#allocation11_spill]] (!%p491_p9)  ;;  %v1164_v55 = vld [vmem:[%s5117_s5] sm:$0xff] (!%p491_p9)  ;;  %v3767_v56 = vmov (!%p491_p9), 0.0|0.0   ;;  %v1165_v57 = vld [vmem:[%s5117_s5 + $0x8] sm:$0xff] (!%p491_p9)  ;;  %v1166_v59 = vld [vmem:[%s5117_s5 + $0x10] sm:$0xff] (!%p491_p9) }
  0x18   : > { %v3283_v58 = vpack.c.bf16 (!%p491_p9), %v1165_v57, %v1164_v55  ;;  %v1167_v60 = vld [vmem:[%s5117_s5 + $0x18] sm:$0xff] (!%p491_p9)  ;;  %v1168_v62 = vld [vmem:[%s5117_s5 + $0x20] sm:$0xff] (!%p491_p9)  ;;  %v1169_v63 = vld [vmem:[%s5117_s5 + $0x28] sm:$0xff] (!%p491_p9)  ;;  %vm971_vm3 = vcmask (!%p491_p9), 1044480   ;;  %vm3768_vm4 = vmmov (!%p491_p9), 1   ;;  %vm964_vm6 = vcmask (!%p491_p9), 236544  }
  0x19   : > { %v3286_v61 = vpack.c.bf16 (!%p491_p9), %v1167_v60, %v1166_v59  ;;  %vm3244_vm5 = vmpackc.low (!%p491_p9), %vm971_vm3, %vm3768_vm4  ;;  %vm1085_vm7 = vcmask (!%p491_p9), 1043456   ;;  %vm1078_vm8 = vcmask (!%p491_p9), 424960   ;;  %vm1326_vm9 = vcmask (!%p491_p9), 1041408   ;;  %s539_s21 = sand.u32 (!%p491_p9), 1, %s3756_s25   ;;  %s5154_s17 = sld [smem:[#allocation13_spill]] (!%p491_p9) }
  0x1a   : > { %vm4283_vm10 = vmpackc.low (!%p491_p9), %vm1326_vm9, %vm3768_vm4  ;;  %vm1321_vm11 = vcmask (!%p491_p9), 736256   ;;  %vm1655_vm13 = vcmask (!%p491_p9), 97280   ;;  %vm1762_vm14 = vcmask (!%p491_p9), 654336   ;;  %vm3769_vm15 = vmmov (!%p491_p9), 0   ;;  %s5155_s0 = sld [smem:[#allocation14_spill]] (!%p491_p9)  ;;  %s2640_s30 = scalar_lea.sflag (!%p491_p9), [#allocation3], %s539_s21 }
  0x1b   : > { %vm3394_vm12 = vmpackc.low (!%p491_p9), %vm1085_vm7, %vm3768_vm4  ;;  %vm2637_vm3 = vcmask (!%p491_p9), 73728  }
  0x1c   : > { %v2714_v0 = vld [vmem:[%s5150_s23 + $0x48] sm:$0xff] (!%p491_p9)  ;;  %v2716_v1 = vld [vmem:[%s5150_s23 + $0x58] sm:$0xff] (!%p491_p9)  ;;  %v2713_v2 = vld [vmem:[%s5150_s23 + $0x40] sm:$0xff] (!%p491_p9) }
  0x1d   : > { %v3215_v3 = vpack.c.bf16 (!%p491_p9), %v2716_v1, %v2714_v0  ;;  %v2715_v4 = vld [vmem:[%s5150_s23 + $0x50] sm:$0xff] (!%p491_p9)  ;;  %v2718_v5 = vld [vmem:[%s5150_s23 + $0x68] sm:$0xff] (!%p491_p9)  ;;  %v2720_v6 = vld [vmem:[%s5150_s23 + $0x78] sm:$0xff] (!%p491_p9)  ;;  %v3289_v0 = vpack.c.bf16 (!%p491_p9), %v1169_v63, %v1168_v62 }
  0x1e   : > { %v3217_v8 = vpack.c.bf16 %v2715_v4, %v2713_v2  ;;  %v3219_v9 = vpack.c.bf16 %v2720_v6, %v2718_v5  ;;  %v2717_v10 = vld [vmem:[%s5150_s23 + $0x60] sm:$0xff]  ;;  %v2719_v11 = vld [vmem:[%s5150_s23 + $0x70] sm:$0xff]  ;;  %s542_s24 = scalar_select %p541_p10, %s3882_s28, 1  ;;  %v551_v12 = vld [vmem:[%s5150_s23 + $0x8] sm:$0xff] }
  0x1f   : > { %3216 = vmatprep.subr.bf16.mxu0 %v3215_v3  ;;  %v553_v13 = vld [vmem:[%s5150_s23 + $0x18] sm:$0xff]  ;;  %3621 = vmatprep.subr.bf16.mxu1 %v3215_v3  ;;  %v3221_v14 = vpack.c.bf16 %v2719_v11, %v2717_v10  ;;  %v550_v15 = vld [vmem:[%s5150_s23] sm:$0xff]  ;;  %v552_v17 = vld [vmem:[%s5150_s23 + $0x10] sm:$0xff] }
  0x20   : > { %3218 = vmatpush1.bf16.msra.mxu0 %v3217_v8  ;;  %s2888_s22 = sshll.u32 %s542_s24, 5  ;;  %3623 = vmatpush1.bf16.msra.mxu1 %v3217_v8  ;;  %v3223_v16 = vpack.c.bf16 %v553_v13, %v551_v12  ;;  %v555_v18 = vld [vmem:[%s5150_s23 + $0x28] sm:$0xff]  ;;  %v557_v19 = vld [vmem:[%s5150_s23 + $0x38] sm:$0xff]  ;;  %v3225_v25 = vpack.c.bf16 %v552_v17, %v550_v15  ;;  %v554_v30 = vld [vmem:[%s5150_s23 + $0x20] sm:$0xff] }
  0x21   : > { %3220 = vmatprep.subr.bf16.mxu0 %v3219_v9  ;;  %s545_s20 = scalar_lea.vmem %s5151_s27, %s2888_s22  ;;  %3622 = vmatprep.subr.bf16.mxu1 %v3219_v9  ;;  %v3227_v29 = vpack.c.bf16 %v557_v19, %v555_v18  ;;  %v556_v31 = vld [vmem:[%s5150_s23 + $0x30] sm:$0xff]  ;;  %v2730_v33 = vld [vmem:[%s5150_s23 + $0x88] sm:$0xff]  ;;  %v2732_v34 = vld [vmem:[%s5150_s23 + $0x98] sm:$0xff]  ;;  %s2885_s27 = sshll.u32 %s3882_s28, 4 }
  0x22   : > { %v546_v20 = vld [vmem:[%s545_s20] sm:$0xff]  ;;  %v3958_v21 = vld [vmem:[%s545_s20 + $0x8] sm:$0xff]  ;;  %v3960_v22 = vld [vmem:[%s545_s20 + $0x10] sm:$0xff]  ;;  %v3229_v37 = vpack.c.bf16 %v556_v31, %v554_v30  ;;  %v3231_v38 = vpack.c.bf16 %v2732_v34, %v2730_v33  ;;  %v898_v30 = vlaneseq  ;;  %s540_s22 = scalar_lea.vmem [#allocation2], %s539_s21  ;;  %s3770_s28 = smov [#allocation2]  }
  0x23   : > { %v572_v23 = vrot.slane %v546_v20, 1  ;;  %v573_v24 = vrot.slane %v3958_v21, 1  ;;  %v575_v26 = vrot.slane %v3960_v22, 1  ;;  %v549_v27 = vld [vmem:[%s545_s20 + $0x18] sm:$0xff]  ;;  %v2729_v39 = vld [vmem:[%s5150_s23 + $0x80] sm:$0xff]  ;;  %v2731_v40 = vld [vmem:[%s5150_s23 + $0x90] sm:$0xff]  ;;  %s5070_s20 = scalar_lea.hbm %s5155_s0, %s2885_s27 }
  0x24   : > { %3222 = vmatpush1.bf16.msra.mxu0 %v3221_v14  ;;  %3624 = vmatpush1.bf16.msra.mxu1 %v3221_v14  ;;  %v577_v32 = vrot.slane %v549_v27, 1  ;;  %v2734_v41 = vld [vmem:[%s5150_s23 + $0xa8] sm:$0xff]  ;;  %v2736_v42 = vld [vmem:[%s5150_s23 + $0xb8] sm:$0xff]  ;;  %v3233_v43 = vpack.c.bf16 %v2731_v40, %v2729_v39  ;;  %v2733_v45 = vld [vmem:[%s5150_s23 + $0xa0] sm:$0xff]  ;;  %v784_v48 = vrot.slane %v546_v20, 2  ;;  %v785_v49 = vrot.slane %v3958_v21, 2 }
  0x25   : > { %v574_v28 = vsel %vm571_vm0, %v572_v23, %v573_v24  ;;  %3224 = vmatprep.subr.bf16.mxu0 %v3223_v16  ;;  %v576_v36 = vsel %vm571_vm0, %v573_v24, %v575_v26  ;;  %v3235_v44 = vpack.c.bf16 %v2736_v42, %v2734_v41  ;;  %v2735_v46 = vld [vmem:[%s5150_s23 + $0xb0] sm:$0xff]  ;;  %v787_v51 = vrot.slane %v3960_v22, 2  ;;  %v1171_v2 = vld [vmem:[%s5117_s5 + $0x38] sm:$0xff]  ;;  %v1172_v4 = vld [vmem:[%s5117_s5 + $0x40] sm:$0xff]  ;;  %s2652_s19 = sshll.u32 %s540_s22, 4  ;;  %s3706_s24 = sshll.u32 %s3770_s28, 4  ;;  %s5072_s19 = int_to_ptr.vmem [resolvable:$true] %s2652_s19  ;;  %s3707_s24 = int_to_ptr.vmem [resolvable:$false] %s3706_s24 }
  0x26   : > { %v578_v35 = vsel %vm571_vm0, %v575_v26, %v577_v32  ;;  %v3237_v47 = vpack.c.bf16 %v2735_v46, %v2733_v45  ;;  %v786_v50 = vsel %vm783_vm2, %v784_v48, %v785_v49  ;;  %v789_v52 = vrot.slane %v549_v27, 2  ;;  %v1170_v1 = vld [vmem:[%s5117_s5 + $0x30] sm:$0xff]  ;;  %v1173_v5 = vld [vmem:[%s5117_s5 + $0x48] sm:$0xff]  ;;  %v1175_v9 = vld [vmem:[%s5117_s5 + $0x58] sm:$0xff]  ;;  %s3702_s18 = scalar_lea.vmem %s5072_s19, 16  ;;  %s3708_s16 = scalar_lea.vmem %s3707_s24, 32 }
  0x27   : > { %2721 = vmatmul.mubr.msk.f32.vlgmr.msra.gmra.mrb[0].mxu0 %vm579_vm1, %v574_v28  ;;  %2723 = vmatmul.mubr.msk.f32.vlgmr.msra.gmra.mrb[0].mxu1 %vm579_vm1, %v578_v35  ;;  %v788_v53 = vsel %vm783_vm2, %v785_v49, %v787_v51  ;;  %v3292_v3 = vpack.c.bf16 %v1171_v2, %v1170_v1  ;;  %v3295_v6 = vpack.c.bf16 %v1173_v5, %v1172_v4  ;;  %v1174_v8 = vld [vmem:[%s5117_s5 + $0x50] sm:$0xff]  ;;  %v1176_v11 = vld [vmem:[%s5117_s5 + $0x60] sm:$0xff]  ;;  %v1177_v12 = vld [vmem:[%s5117_s5 + $0x68] sm:$0xff]  ;;  %v4105_v31 = vshrl.u32 %v898_v30, 7  ;;  %p3703_p11 = scmp.ne.s32.totalorder %s5072_s19, %s3702_s18  ;;  %p3709_p0 = scmp.lt.s32.totalorder %s5072_s19, %s3707_s24 }
  0x28   : > { %3226 = vmatpush1.bf16.msra.mxu0 %v3225_v25  ;;  %658 = vmatprep.mubr.f32.mxu0 %v3766_v7  ;;  %v790_v54 = vsel %vm783_vm2, %v787_v51, %v789_v52  ;;  %v3298_v10 = vpack.c.bf16 %v1175_v9, %v1174_v8  ;;  %v3301_v13 = vpack.c.bf16 %v1177_v12, %v1176_v11  ;;  %v1178_v14 = vld [vmem:[%s5117_s5 + $0x70] sm:$0xff]  ;;  %v1179_v15 = vld [vmem:[%s5117_s5 + $0x78] sm:$0xff]  ;;  %v1180_v17 = vld [vmem:[%s5117_s5 + $0x80] sm:$0xff]  ;;  %p3710_p1 = scmp.lt.s32.totalorder %s3708_s16, %s3702_s18 }
  0x29   : > { %3228 = vmatprep.subr.bf16.mxu0 %v3227_v29  ;;  %670 = vmatprep.mubr.f32.mxu1 %v3766_v7  ;;  %v3304_v16 = vpack.c.bf16 %v1179_v15, %v1178_v14  ;;  %v1181_v18 = vld [vmem:[%s5117_s5 + $0x88] sm:$0xff]  ;;  %v1184_v23 = vld [vmem:[%s5117_s5 + $0xa0] sm:$0xff]  ;;  %v904_v34 = vsub.s32 1, %v4105_v31  ;;  %p3704_p12 = pnand %p3703_p11, %p3899_p5 }
  0x2a   : > { %v3307_v19 = vpack.c.bf16 %v1181_v18, %v1180_v17  ;;  %v1185_v24 = vld [vmem:[%s5117_s5 + $0xa8] sm:$0xff]  ;;  %v896_v33 = vld [vmem:[%s5114_s2] sm:$0x3]  ;;  %p3711_p2 = por %p3710_p1, %p3709_p0 }
  0x2b   : > { %2722 = vmatmul.mubr.msk.f32.gmra.mrb[2].mxu0 %vm579_vm1, %v576_v36  ;;  %2724 = vmatmul.mubr.msk.f32.gmra.mrb[2].mxu1 %vm579_vm1, %v577_v32  ;;  %v3313_v25 = vpack.c.bf16 %v1185_v24, %v1184_v23  ;;  %v900_v32 = vsub.s32 0, %v4105_v31  ;;  %v905_v36 = vrot.slane %v896_v33, %v904_v34  ;;  %v1056_v30 = vld [vmem:[%s5116_s4 + $0x8] sm:$0xff]  ;;  %p3705_p13 = pneg %p3704_p12 }
  0x2c   : > { %3230 = vmatpush1.bf16.msra.mxu0 %v3229_v37  ;;  %749 = vmatprep.mubr.f32.mxu0 %v3766_v7 }
  0x2d   : > { %3232 = vmatprep.subr.bf16.mxu0 %v3231_v38  ;;  %1042 = vmatprep.mubr.f32.mxu1 %v3766_v7  ;;  %v901_v35 = vrot.slane %v896_v33, %v900_v32  ;;  %v962_v33 = vld [vmem:[%s5115_s3] sm:$0xff]  ;;  %p3712_p3 = pnand %p3711_p2, %p3705_p13 }
  0x2f   : > { %2725 = vmatmul.mubr.msk.f32.vlgmr.msra.gmra.mrb[0].mxu0 %vm579_vm1, %v546_v20  ;;  %v1182_v20 = vld [vmem:[%s5117_s5 + $0x90] sm:$0xff] }
  0x30   : > { %755 = vmatprep.mubr.f32.mxu0 %v3766_v7  ;;  %3234 = vmatpush1.bf16.msra.mxu0 %v3233_v43 }
  0x31   : > { %3236 = vmatprep.subr.bf16.mxu0 %v3235_v44 }
  0x33   : > { %2726 = vmatmul.mubr.msk.f32.gmra.mrb[2].mxu0 %vm579_vm1, %v3958_v21  ;;  %v1183_v21 = vld [vmem:[%s5117_s5 + $0x98] sm:$0xff] }
  0x34   : > { %761 = vmatprep.mubr.f32.mxu0 %v3766_v7  ;;  %3238 = vmatpush1.bf16.msra.mxu0 %v3237_v47 }
  0x35   : > { %3282 = vmatprep.subr.bf16.mxu0 %v3767_v56 }
  0x37   : > { %2727 = vmatmul.mubr.msk.f32.gmra.mrb[4].mxu0 %vm579_vm1, %v3960_v22  ;;  %v3310_v22 = vpack.c.bf16 %v1183_v21, %v1182_v20 }
  0x38   : > { %767 = vmatprep.mubr.f32.mxu0 %v3766_v7 }
  0x3b   : > { %2728 = vmatmul.mubr.msk.f32.gmra.mrb[6].mxu0 %vm579_vm1, %v549_v27 }
  0x3c   : > { %863 = vmatprep.mubr.f32.mxu0 %v3766_v7 }
  0x3f   : > { %2737 = vmatmul.mubr.msk.f32.vlgmr.msra.gmra.mrb[0].mxu0 %vm579_vm1, %v786_v50 }
  0x40   : > { %869 = vmatprep.mubr.f32.mxu0 %v3766_v7  ;;  %3284 = vmatpush1.bf16.msra.mxu0 %v3283_v58 }
  0x41   : > { %3285 = vmatprep.subr.bf16.mxu0 %v3767_v56 }
  0x43   : > { %2738 = vmatmul.mubr.msk.f32.gmra.mrb[2].mxu0 %vm579_vm1, %v788_v53 }
  0x44   : > { %875 = vmatprep.mubr.f32.mxu0 %v3766_v7  ;;  %3287 = vmatpush1.bf16.msra.mxu0 %v3286_v61 }
  0x45   : > { %3288 = vmatprep.subr.bf16.mxu0 %v3767_v56 }
  0x47   : > { %2739 = vmatmul.mubr.msk.f32.gmra.mrb[4].mxu0 %vm579_vm1, %v790_v54 }
  0x48   : > { %881 = vmatprep.mubr.f32.mxu0 %v3766_v7  ;;  %3290 = vmatpush1.bf16.msra.mxu0 %v3289_v0 }
  0x49   : > { %3291 = vmatprep.subr.bf16.mxu0 %v3767_v56 }
  0x4b   : > { %2740 = vmatmul.mubr.msk.f32.gmra.mrb[6].mxu0 %vm579_vm1, %v789_v52  ;;  %vm2473_vm1 = vcmask 982016  }
  0x4c   : > { %3293 = vmatpush1.bf16.msra.mxu0 %v3292_v3 }
  0x4d   : > { %3294 = vmatprep.subr.bf16.mxu0 %v3767_v56 }
  0x50   : > { %3296 = vmatpush1.bf16.msra.mxu0 %v3295_v6 }
  0x51   : > { %3297 = vmatprep.subr.bf16.mxu0 %v3767_v56 }
  0x54   : > { %3299 = vmatpush1.bf16.msra.mxu0 %v3298_v10 }
  0x55   : > { %3300 = vmatprep.subr.bf16.mxu0 %v3767_v56 }
  0x58   : > { %3302 = vmatpush1.bf16.msra.mxu0 %v3301_v13 }
  0x59   : > { %3303 = vmatprep.subr.bf16.mxu0 %v3767_v56 }
  0x5c   : > { %3305 = vmatpush1.bf16.msra.mxu0 %v3304_v16 }
  0x5d   : > { %3306 = vmatprep.subr.bf16.mxu0 %v3767_v56 }
  0x60   : > { %3308 = vmatpush1.bf16.msra.mxu0 %v3307_v19 }
  0x61   : > { %3309 = vmatprep.subr.bf16.mxu0 %v3767_v56 }
  0x64   : > { %3311 = vmatpush1.bf16.msra.mxu0 %v3310_v22 }
  0x65   : > { %3312 = vmatprep.subr.bf16.mxu0 %v3767_v56 }
  0x68   : > { %3314 = vmatpush1.bf16.msra.mxu0 %v3313_v25 }
  0x69   : > { %1234 = vmatprep.subr.mxu0 %v3766_v7 }
  0xfa   : > { %v666_v26 = vpop.f32.mrb[0].mxu1 }
  0xfb   : > { %v668_v27 = vpop.f32.mrb[1].mxu1 }
  0xfe   : > { %v672_v28 = vpop.f32.mrb[2].mxu1 }
  0xff   : > { %v674_v29 = vpop.f32.mrb[3].mxu1 }
 0x112   : > { %v865_v37 = vpop.f32.mrb[0].mxu0 }
 0x113   : > { %v908_v38 = vadd.f32 %v901_v35, %v865_v37  ;;  %v867_v39 = vpop.f32.mrb[1].mxu0  ;;  %v1058_v37 = vld [vmem:[%s5116_s4 + $0x18] sm:$0xff] }
 0x114   : > { %v909_v40 = vadd.f32 %v905_v36, %v867_v39 }
 0x115   : > { %v916_v42 = vmax.f32 %v908_v38, 0.0  ;;  %v963_v38 = vld [vmem:[%s5115_s3 + $0x8] sm:$0x7f] }
 0x116   : > { %v871_v41 = vpop.f32.mrb[2].mxu0  ;;  %v917_v45 = vmax.f32 %v909_v40, 0.0  ;;  %v1059_v40 = vld [vmem:[%s5116_s4 + $0x20] sm:$0xff] }
 0x117   : > { %v910_v43 = vadd.f32 %v901_v35, %v871_v41  ;;  %v873_v44 = vpop.f32.mrb[3].mxu0  ;;  %v932_v50 = vrot.slane %v916_v42, 1  ;;  %v1060_v41 = vld [vmem:[%s5116_s4 + $0x28] sm:$0xff] }
 0x118   : > { %v911_v46 = vadd.f32 %v905_v36, %v873_v44  ;;  %v935_v54 = vrot.slane %v917_v45, 1  ;;  %v1062_v44 = vld [vmem:[%s5116_s4 + $0x38] sm:$0xff] }
 0x119   : > { %v918_v47 = vmax.f32 %v910_v43, 0.0  ;;  %v1061_v43 = vld [vmem:[%s5116_s4 + $0x30] sm:$0xff] }
 0x11a   : > { %v919_v48 = vmax.f32 %v911_v46, 0.0  ;;  %v877_v49 = vpop.f32.mrb[4].mxu0  ;;  %v1063_v46 = vld [vmem:[%s5116_s4 + $0x40] sm:$0xff] }
 0x11b   : > { %v933_v51 = vrot.slane %v918_v47, 1  ;;  %v3625_v52 = vadd.f32 %v877_v49, %v666_v26  ;;  %v879_v53 = vpop.f32.mrb[5].mxu0  ;;  %v1065_v49 = vld [vmem:[%s5116_s4 + $0x50] sm:$0xff] }
 0x11c   : > { %v936_v55 = vrot.slane %v919_v48, 1  ;;  %v3626_v57 = vadd.f32 %v879_v53, %v668_v27  ;;  %v1068_v53 = vld [vmem:[%s5116_s4 + $0x68] sm:$0xff] }
 0x11d   : > { %v934_v58 = vsel %vm571_vm0, %v932_v50, %v933_v51  ;;  %v912_v59 = vadd.f32 %v3625_v52, %v901_v35  ;;  %v1066_v50 = vld [vmem:[%s5116_s4 + $0x58] sm:$0xff]  ;;  %v1067_v52 = vld [vmem:[%s5116_s4 + $0x60] sm:$0xff] }
 0x11e   : > { %v954_v60 = vmax.f32 %v916_v42, %v934_v58  ;;  %v913_v61 = vadd.f32 %v3626_v57, %v905_v36  ;;  %v883_v62 = vpop.f32.mrb[6].mxu0  ;;  %v937_v63 = vsel %vm571_vm0, %v935_v54, %v936_v55  ;;  %v3256_v42 = vpack.c.bf16 %v1060_v41, %v1059_v40  ;;  %v1070_v57 = vld [vmem:[%s5116_s4 + $0x78] sm:$0xff]  ;;  %v2767_v41 = vld [vmem:[%s5118_s6 + $0x140] sm:$0xff] }
 0x11f   : > { %v920_v0 = vmax.f32 %v912_v59, 0.0  ;;  %v3627_v1 = vadd.f32 %v883_v62, %v672_v28  ;;  %v885_v2 = vpop.f32.mrb[7].mxu0  ;;  %v955_v3 = vmax.f32 %v917_v45, %v937_v63  ;;  %v3259_v45 = vpack.c.bf16 %v1062_v44, %v1061_v43  ;;  %v1071_v59 = vld [vmem:[%s5116_s4 + $0x80] sm:$0xff]  ;;  %v1073_v62 = vld [vmem:[%s5116_s4 + $0x90] sm:$0xff]  ;;  %v1074_v63 = vld [vmem:[%s5116_s4 + $0x98] sm:$0xff] }
 0x120   : > { %v921_v4 = vmax.f32 %v913_v61, 0.0  ;;  %v3628_v5 = vadd.f32 %v885_v2, %v674_v29  ;;  %v1055_v29 = vld [vmem:[%s5116_s4] sm:$0xff]  ;;  %v3268_v54 = vpack.c.bf16 %v1068_v53, %v1067_v52  ;;  %v1076_v2 = vld [vmem:[%s5116_s4 + $0xa8] sm:$0xff]  ;;  %v1270_v52 = vld [vmem:[%s5118_s6 + $0x18] sm:$0xff] }
 0x121   : > { %v938_v6 = vrot.slane %v920_v0, 1  ;;  %v914_v8 = vadd.f32 %v3627_v1, %v901_v35  ;;  %v3250_v35 = vpack.c.bf16 %v1056_v30, %v1055_v29  ;;  %v1075_v1 = vld [vmem:[%s5116_s4 + $0xa0] sm:$0xff]  ;;  %v2766_v29 = vld [vmem:[%s5118_s6 + $0x138] sm:$0xff]  ;;  %v1837_v44 = vld [vmem:[%s5122_s10 + $0x8] sm:$0xff] }
 0x122   : > { %v940_v9 = vrot.slane %v921_v4, 1  ;;  %v915_v10 = vadd.f32 %v3628_v5, %v905_v36  ;;  %v1057_v36 = vld [vmem:[%s5116_s4 + $0x10] sm:$0xff] }
 0x123   : > { %v939_v11 = vsel %vm571_vm0, %v933_v51, %v938_v6  ;;  %v922_v12 = vmax.f32 %v914_v8, 0.0  ;;  %v3253_v39 = vpack.c.bf16 %v1058_v37, %v1057_v36  ;;  %v3265_v51 = vpack.c.bf16 %v1066_v50, %v1065_v49  ;;  %v1186_v5 = vld [vmem:[%s5117_s5 + $0xb0] sm:$0xf]  ;;  %v2754_v8 = vld [vmem:[%s5118_s6 + $0xd8] sm:$0xff] }
 0x124   : > { %v923_v13 = vmax.f32 %v915_v10, 0.0  ;;  %v941_v14 = vsel %vm571_vm0, %v936_v55, %v940_v9  ;;  %v956_v15 = vmax.f32 %v918_v47, %v939_v11  ;;  %v1064_v47 = vld [vmem:[%s5116_s4 + $0x48] sm:$0xff]  ;;  %v1069_v55 = vld [vmem:[%s5116_s4 + $0x70] sm:$0xff]  ;;  %2748 = vmatpush1.msk.msra.mxu0 %vm1085_vm7, %v1186_v5  ;;  %v2751_v10 = vld [vmem:[%s5118_s6 + $0xc0] sm:$0xff] }
 0x125   : > { %v942_v16 = vrot.slane %v922_v12, 1  ;;  %v957_v17 = vmax.f32 %v919_v48, %v941_v14  ;;  %v3262_v48 = vpack.c.bf16 %v1064_v47, %v1063_v46  ;;  %v3271_v58 = vpack.c.bf16 %v1070_v57, %v1069_v55  ;;  %v2753_v11 = vld [vmem:[%s5118_s6 + $0xd0] sm:$0xff]  ;;  %v2774_v46 = vld [vmem:[%s5118_s6 + $0x178] sm:$0x3] }
 0x126   : > { %v944_v18 = vrot.slane %v923_v13, 1  ;;  %v3241_v19 = vpack.c.bf16 %v956_v15, %v954_v60  ;;  %v1072_v60 = vld [vmem:[%s5116_s4 + $0x88] sm:$0xff]  ;;  %v3317_v15 = vpack.c.bf16 %v2753_v11, %v2751_v10  ;;  %v2765_v36 = vld [vmem:[%s5118_s6 + $0x130] sm:$0xff] }
 0x127   : > { %v943_v20 = vsel %vm571_vm0, %v938_v6, %v942_v16  ;;  %v960_v21 = vmax.f32 %v922_v12, %v942_v16  ;;  %v3239_v22 = vpack.c.bf16 %v957_v17, %v955_v3  ;;  %v3274_v61 = vpack.c.bf16 %v1072_v60, %v1071_v59  ;;  %v2752_v6 = vld [vmem:[%s5118_s6 + $0xc8] sm:$0xff]  ;;  %v2773_v49 = vld [vmem:[%s5118_s6 + $0x170] sm:$0x3]  ;;  %v1267_v60 = vld [vmem:[%s5118_s6] sm:$0xff] }
 0x128   : > { %v958_v23 = vmax.f32 %v920_v0, %v943_v20  ;;  %v945_v24 = vsel %vm571_vm0, %v940_v9, %v944_v18  ;;  %v961_v25 = vmax.f32 %v923_v13, %v944_v18  ;;  %v3277_v0 = vpack.c.bf16 %v1074_v63, %v1073_v62  ;;  %v2756_v12 = vld [vmem:[%s5118_s6 + $0xe8] sm:$0xff]  ;;  %v2758_v13 = vld [vmem:[%s5118_s6 + $0xf8] sm:$0xff]  ;;  %v2755_v18 = vld [vmem:[%s5118_s6 + $0xe0] sm:$0xff] }
 0x129   : > { %v959_v26 = vmax.f32 %v921_v4, %v945_v24  ;;  %3240 = vmatprep.subr.bf16.mxu1 %v3239_v22  ;;  %v3280_v3 = vpack.c.bf16 %v1076_v2, %v1075_v1  ;;  %v1077_v4 = vld [vmem:[%s5116_s4 + $0xb0] sm:$0xf]  ;;  %v3315_v9 = vpack.c.bf16 %v2754_v8, %v2752_v6  ;;  %v3319_v17 = vpack.c.bf16 %v2758_v13, %v2756_v12  ;;  %v2760_v20 = vld [vmem:[%s5118_s6 + $0x108] sm:$0xff]  ;;  %v1271_v12 = vld [vmem:[%s5118_s6 + $0x20] sm:$0xff] }
 0x12a   : > { %v3246_v27 = vpack.c.bf16 %v960_v21, %v958_v23  ;;  %3242 = vmatpush1.bf16.msra.mxu1 %v3241_v19  ;;  %v2757_v19 = vld [vmem:[%s5118_s6 + $0xf0] sm:$0xff]  ;;  %v2762_v21 = vld [vmem:[%s5118_s6 + $0x118] sm:$0xff] }
 0x12b   : > { %v3243_v28 = vpack.c.bf16 %v961_v25, %v959_v26  ;;  %v3321_v23 = vpack.c.bf16 %v2757_v19, %v2755_v18  ;;  %v3323_v25 = vpack.c.bf16 %v2762_v21, %v2760_v20  ;;  %v2759_v26 = vld [vmem:[%s5118_s6 + $0x100] sm:$0xff]  ;;  %v1273_v13 = vld [vmem:[%s5118_s6 + $0x30] sm:$0xff] }
 0x12c   : > { %v3347_v18 = vpack.c.bf16 %v1273_v13, %v1271_v12  ;;  %v1275_v20 = vld [vmem:[%s5118_s6 + $0x40] sm:$0xff]  ;;  %v1277_v21 = vld [vmem:[%s5118_s6 + $0x50] sm:$0xff] }
 0x12d   : > { %3245 = vmatprep.subr.msk.bf16.mxu1 %vm3244_vm5, %v3243_v28  ;;  %v2764_v28 = vld [vmem:[%s5118_s6 + $0x128] sm:$0xff]  ;;  %v2799_v12 = vld [vmem:[%s5118_s6 + $0x200] sm:$0xff]  ;;  %v2801_v13 = vld [vmem:[%s5118_s6 + $0x210] sm:$0xff] }
 0x12e   : > { %3248 = vmatpush1.bf16.msk.msra.mxu1 %vm3244_vm5, %v3246_v27  ;;  %v2761_v27 = vld [vmem:[%s5118_s6 + $0x110] sm:$0xff] }
 0x12f   : > { %3249 = vmatprep.subr.bf16.mxu1 %v3767_v56  ;;  %v3325_v30 = vpack.c.bf16 %v2761_v27, %v2759_v26  ;;  %v1279_v26 = vld [vmem:[%s5118_s6 + $0x60] sm:$0xff]  ;;  %v1281_v27 = vld [vmem:[%s5118_s6 + $0x70] sm:$0xff] }
 0x131   : > { %2743 = vmatmul.mubr.msk.f32.vlgmr.msra.gmra.mrb[4].mxu1 %vm964_vm6, %v962_v33  ;;  %v3327_v33 = vpack.c.bf16 %v2766_v29, %v2764_v28  ;;  %v1284_v28 = vld [vmem:[%s5118_s6 + $0x88] sm:$0xff]  ;;  %v1286_v29 = vld [vmem:[%s5118_s6 + $0x98] sm:$0xff] }
 0x132   : > { %1048 = vmatprep.mubr.f32.mxu1 %v3766_v7  ;;  %3251 = vmatpush1.bf16.msra.mxu1 %v3250_v35  ;;  %v2763_v35 = vld [vmem:[%s5118_s6 + $0x120] sm:$0xff] }
 0x133   : > { %3252 = vmatprep.subr.bf16.mxu1 %v3767_v56  ;;  %v3329_v37 = vpack.c.bf16 %v2765_v36, %v2763_v35  ;;  %v1283_v35 = vld [vmem:[%s5118_s6 + $0x80] sm:$0xff]  ;;  %v1285_v36 = vld [vmem:[%s5118_s6 + $0x90] sm:$0xff] }
 0x135   : > { %2744 = vmatmul.mubr.msk.f32.gmra.mrb[6].mxu1 %vm964_vm6, %v963_v38  ;;  %v2768_v38 = vld [vmem:[%s5118_s6 + $0x148] sm:$0xff] }
 0x136   : > { %3254 = vmatpush1.bf16.msra.mxu1 %v3253_v39  ;;  %v2770_v39 = vld [vmem:[%s5118_s6 + $0x158] sm:$0xff] }
 0x137   : > { %3255 = vmatprep.subr.bf16.mxu1 %v3767_v56  ;;  %v3331_v40 = vpack.c.bf16 %v2770_v39, %v2768_v38  ;;  %v1290_v38 = vld [vmem:[%s5118_s6 + $0xb8] sm:$0x3]  ;;  %v3359_v39 = vpack.c.bf16 %v1285_v36, %v1283_v35  ;;  %v1846_v36 = vld [vmem:[%s5122_s10 + $0x50] sm:$0xff] }
 0x13a   : > { %3257 = vmatpush1.bf16.msra.mxu1 %v3256_v42  ;;  %v2769_v42 = vld [vmem:[%s5118_s6 + $0x150] sm:$0xff] }
 0x13b   : > { %3258 = vmatprep.subr.bf16.mxu1 %v3767_v56  ;;  %v3333_v43 = vpack.c.bf16 %v2769_v42, %v2767_v41  ;;  %v1287_v41 = vld [vmem:[%s5118_s6 + $0xa0] sm:$0xff]  ;;  %v1289_v42 = vld [vmem:[%s5118_s6 + $0xb0] sm:$0x3] }
 0x13e   : > { %3260 = vmatpush1.bf16.msra.mxu1 %v3259_v45  ;;  %v2772_v45 = vld [vmem:[%s5118_s6 + $0x168] sm:$0xff] }
 0x13f   : > { %3261 = vmatprep.subr.bf16.mxu1 %v3767_v56  ;;  %v3335_v47 = vpack.c.bf16 %v2774_v46, %v2772_v45  ;;  %v2786_v45 = vld [vmem:[%s5118_s6 + $0x198] sm:$0xff]  ;;  %v3364_v46 = vpack.c.bf16 %v1289_v42, %v1287_v41  ;;  %v1850_v42 = vld [vmem:[%s5122_s10 + $0x70] sm:$0xff] }
 0x142   : > { %3263 = vmatpush1.bf16.msra.mxu1 %v3262_v48  ;;  %v2771_v48 = vld [vmem:[%s5118_s6 + $0x160] sm:$0xff] }
 0x143   : > { %3264 = vmatprep.subr.bf16.mxu1 %v3767_v56  ;;  %v3338_v50 = vpack.c.bf16 %v2773_v49, %v2771_v48  ;;  %v2783_v48 = vld [vmem:[%s5118_s6 + $0x180] sm:$0xff]  ;;  %v2785_v49 = vld [vmem:[%s5118_s6 + $0x190] sm:$0xff] }
 0x146   : > { %3266 = vmatpush1.bf16.msra.mxu1 %v3265_v51  ;;  %v1268_v51 = vld [vmem:[%s5118_s6 + $0x8] sm:$0xff] }
 0x147   : > { %3267 = vmatprep.subr.bf16.mxu1 %v3767_v56  ;;  %v3341_v53 = vpack.c.bf16 %v1270_v52, %v1268_v51  ;;  %v2790_v51 = vld [vmem:[%s5118_s6 + $0x1b8] sm:$0xff]  ;;  %v3369_v52 = vpack.c.bf16 %v2785_v49, %v2783_v48  ;;  %v1854_v49 = vld [vmem:[%s5122_s10 + $0x90] sm:$0xff] }
 0x14a   : > { %3269 = vmatpush1.bf16.msra.mxu1 %v3268_v54 }
 0x14b   : > { %3270 = vmatprep.subr.bf16.mxu1 %v3767_v56 }
 0x14e   : > { %3272 = vmatpush1.bf16.msra.mxu1 %v3271_v58 }
 0x14f   : > { %3273 = vmatprep.subr.bf16.mxu1 %v3767_v56 }
 0x152   : > { %3275 = vmatpush1.bf16.msra.mxu1 %v3274_v61  ;;  %v1269_v61 = vld [vmem:[%s5118_s6 + $0x10] sm:$0xff] }
 0x153   : > { %3276 = vmatprep.subr.bf16.mxu1 %v3767_v56  ;;  %v3343_v5 = vpack.c.bf16 %v1269_v61, %v1267_v60 }
 0x156   : > { %3278 = vmatpush1.bf16.msra.mxu1 %v3277_v0 }
 0x157   : > { %3279 = vmatprep.subr.bf16.mxu1 %v3767_v56 }
 0x15a   : > { %3281 = vmatpush1.bf16.msra.mxu1 %v3280_v3  ;;  %v1272_v3 = vld [vmem:[%s5118_s6 + $0x28] sm:$0xff] }
 0x15b   : > { %1133 = vmatprep.subr.mxu1 %v3766_v7 }
 0x15e   : > { %2745 = vmatpush1.msk.msra.mxu1 %vm1085_vm7, %v1077_v4  ;;  %v1274_v4 = vld [vmem:[%s5118_s6 + $0x38] sm:$0xff] }
 0x15f   : > { %3316 = vmatprep.subr.bf16.mxu1 %v3315_v9  ;;  %v3345_v11 = vpack.c.bf16 %v1274_v4, %v1272_v3  ;;  %v2795_v4 = vld [vmem:[%s5118_s6 + $0x1e0] sm:$0xff] }
 0x204   : > { %v1044_v14 = vpop.f32.mrb[4].mxu1 }
 0x205   : > { %v1046_v16 = vpop.f32.mrb[5].mxu1 }
 0x206   : > { %2746 = vmatprep.mubr.msk.f32.mxu1 %vm1078_vm8, %v1046_v16  ;;  %2749 = vmatprep.mubr.msk.f32.mxu0 %vm1078_vm8, %v1046_v16  ;;  %v1278_v16 = vld [vmem:[%s5118_s6 + $0x58] sm:$0xff] }
 0x207   : > { %1154 = vmatmul.mubr.f32.vlgmr.msra.gmra.mrb[8].mxu1 %v1044_v14  ;;  %1255 = vmatmul.mubr.f32.vlgmr.msra.gmra.mrb[8].mxu0 %v1044_v14 }
 0x208   : > { %v1050_v22 = vpop.f32.mrb[6].mxu1  ;;  %3318 = vmatpush1.bf16.msra.mxu1 %v3317_v15  ;;  %v1276_v15 = vld [vmem:[%s5118_s6 + $0x48] sm:$0xff] }
 0x209   : > { %v1052_v24 = vpop.f32.mrb[7].mxu1  ;;  %3320 = vmatprep.subr.bf16.mxu1 %v3319_v17  ;;  %v3349_v19 = vpack.c.bf16 %v1278_v16, %v1276_v15  ;;  %v2806_v15 = vld [vmem:[%s5118_s6 + $0x238] sm:$0x3]  ;;  %v3385_v16 = vpack.c.bf16 %v2801_v13, %v2799_v12 }
 0x20a   : > { %2747 = vmatprep.mubr.msk.f32.mxu1 %vm1078_vm8, %v1052_v24  ;;  %2750 = vmatprep.mubr.msk.f32.mxu0 %vm1078_vm8, %v1052_v24  ;;  %v3351_v24 = vpack.c.bf16 %v1277_v21, %v1275_v20  ;;  %v2805_v20 = vld [vmem:[%s5118_s6 + $0x230] sm:$0x3] }
 0x20b   : > { %1159 = vmatmul.mubr.f32.gmra.mrb[10].mxu1 %v1050_v22  ;;  %1260 = vmatmul.mubr.f32.gmra.mrb[10].mxu0 %v1050_v22  ;;  %v1280_v22 = vld [vmem:[%s5118_s6 + $0x68] sm:$0xff] }
 0x20c   : > { %3322 = vmatpush1.bf16.msra.mxu1 %v3321_v23  ;;  %1397 = vmatprep.mubr.f32.mxu1 %v3766_v7  ;;  %v1282_v23 = vld [vmem:[%s5118_s6 + $0x78] sm:$0xff] }
 0x20d   : > { %3324 = vmatprep.subr.bf16.mxu1 %v3323_v25  ;;  %1729 = vmatprep.mubr.f32.mxu0 %v3766_v7  ;;  %v3353_v25 = vpack.c.bf16 %v1282_v23, %v1280_v22  ;;  %v1836_v22 = vld [vmem:[%s5122_s10] sm:$0xff] }
 0x20e   : > { %v3439_v23 = vpack.c.bf16 %v1837_v44, %v1836_v22  ;;  %v1736_v44 = vld [vmem:[%s5121_s9] sm:$0xff] }
 0x210   : > { %3326 = vmatpush1.bf16.msra.mxu1 %v3325_v30  ;;  %v3355_v30 = vpack.c.bf16 %v1281_v27, %v1279_v26  ;;  %v1842_v27 = vld [vmem:[%s5122_s10 + $0x30] sm:$0xff] }
 0x211   : > { %3328 = vmatprep.subr.bf16.mxu1 %v3327_v33  ;;  %v3357_v33 = vpack.c.bf16 %v1286_v29, %v1284_v28  ;;  %v1843_v28 = vld [vmem:[%s5122_s10 + $0x38] sm:$0xff] }
 0x212   : > { %v3448_v29 = vpack.c.bf16 %v1843_v28, %v1842_v27  ;;  %v1741_v27 = vld [vmem:[%s5121_s9 + $0x28] sm:$0xff] }
 0x214   : > { %3330 = vmatpush1.bf16.msra.mxu1 %v3329_v37  ;;  %v1288_v37 = vld [vmem:[%s5118_s6 + $0xa8] sm:$0xff] }
 0x215   : > { %3332 = vmatprep.subr.bf16.mxu1 %v3331_v40  ;;  %v3361_v40 = vpack.c.bf16 %v1290_v38, %v1288_v37  ;;  %v1847_v37 = vld [vmem:[%s5122_s10 + $0x58] sm:$0xff] }
 0x216   : > { %v3454_v38 = vpack.c.bf16 %v1847_v37, %v1846_v36  ;;  %v1745_v36 = vld [vmem:[%s5121_s9 + $0x48] sm:$0xff] }
 0x218   : > { %3334 = vmatpush1.bf16.msra.mxu1 %v3333_v43  ;;  %v2784_v43 = vld [vmem:[%s5118_s6 + $0x188] sm:$0xff] }
 0x219   : > { %3337 = vmatprep.subr.msk.bf16.mxu1 %vm4283_vm10, %v3335_v47  ;;  %v3367_v47 = vpack.c.bf16 %v2786_v45, %v2784_v43  ;;  %v1851_v43 = vld [vmem:[%s5122_s10 + $0x78] sm:$0xff] }
 0x21a   : > { %v3460_v45 = vpack.c.bf16 %v1851_v43, %v1850_v42  ;;  %v1749_v42 = vld [vmem:[%s5121_s9 + $0x68] sm:$0xff] }
 0x21c   : > { %3340 = vmatpush1.bf16.msk.msra.mxu1 %vm4283_vm10, %v3338_v50  ;;  %v2788_v50 = vld [vmem:[%s5118_s6 + $0x1a8] sm:$0xff] }
 0x21d   : > { %3342 = vmatprep.subr.bf16.mxu1 %v3341_v53  ;;  %v3371_v53 = vpack.c.bf16 %v2790_v51, %v2788_v50  ;;  %v1855_v50 = vld [vmem:[%s5122_s10 + $0x98] sm:$0xff] }
 0x21e   : > { %v3466_v51 = vpack.c.bf16 %v1855_v50, %v1854_v49  ;;  %v1753_v49 = vld [vmem:[%s5121_s9 + $0x88] sm:$0xff] }
 0x2da   : > { %v1155_v54 = vpop.f32.mrb[8].mxu1  ;;  %v1256_v55 = vpop.f32.mrb[8].mxu0 }
 0x2db   : > { %v4309_v57 = vmax.f32 %v1155_v54, %v1256_v55  ;;  %v1157_v58 = vpop.f32.mrb[9].mxu1  ;;  %v1258_v59 = vpop.f32.mrb[9].mxu0  ;;  %v2787_v54 = vld [vmem:[%s5118_s6 + $0x1a0] sm:$0xff]  ;;  %v2789_v55 = vld [vmem:[%s5118_s6 + $0x1b0] sm:$0xff] }
 0x2dc   : > { %v2792_v58 = vld [vmem:[%s5118_s6 + $0x1c8] sm:$0xff]  ;;  %v2794_v59 = vld [vmem:[%s5118_s6 + $0x1d8] sm:$0xff]  ;;  %v3373_v60 = vpack.c.bf16 %v2789_v55, %v2787_v54  ;;  %v1858_v55 = vld [vmem:[%s5122_s10 + $0xb0] sm:$0xff] }
 0x2dd   : > { %v1318_v6 = vrot.slane %v4309_v57, 1  ;;  %v1522_v8 = vrot.slane %v4309_v57, 2  ;;  %v3375_v61 = vpack.c.bf16 %v2794_v59, %v2792_v58  ;;  %v1859_v58 = vld [vmem:[%s5122_s10 + $0xb8] sm:$0xff] }
 0x2de   : > { %v1160_v62 = vpop.f32.mrb[10].mxu1  ;;  %v1261_v63 = vpop.f32.mrb[10].mxu0  ;;  %v3472_v59 = vpack.c.bf16 %v1859_v58, %v1858_v55  ;;  %v1757_v55 = vld [vmem:[%s5121_s9 + $0xa8] sm:$0xff] }
 0x2df   : > { %v4317_v0 = vmax.f32 %v1160_v62, %v1261_v63  ;;  %v1162_v1 = vpop.f32.mrb[11].mxu1  ;;  %v1263_v2 = vpop.f32.mrb[11].mxu0  ;;  %v2791_v62 = vld [vmem:[%s5118_s6 + $0x1c0] sm:$0xff]  ;;  %v2793_v63 = vld [vmem:[%s5118_s6 + $0x1d0] sm:$0xff] }
 0x2e0   : > { %v2796_v1 = vld [vmem:[%s5118_s6 + $0x1e8] sm:$0xff]  ;;  %v3377_v2 = vpack.c.bf16 %v2793_v63, %v2791_v62 }
 0x2e1   : > { %v1319_v9 = vrot.slane %v4317_v0, 1  ;;  %v1523_v10 = vrot.slane %v4317_v0, 2 }
 0x2e3   : > { %v1320_v14 = vsel %vm571_vm0, %v1318_v6, %v1319_v9  ;;  %v4345_v17 = vsel %vm783_vm2, %v1522_v8, %v1523_v10  ;;  %v2800_v6 = vld [vmem:[%s5118_s6 + $0x208] sm:$0xff]  ;;  %v2802_v8 = vld [vmem:[%s5118_s6 + $0x218] sm:$0xff]  ;;  %vm2560_vm2 = vcmask 687104  }
 0x2e4   : > { %2777 = vmatmul.mubr.msk.f32.vlgmr.msra.gmra.mrb[12].mxu1 %vm1321_vm11, %v1320_v14  ;;  %v2804_v14 = vld [vmem:[%s5118_s6 + $0x228] sm:$0xff] }
 0x2e5   : > { %3344 = vmatpush1.bf16.msra.mxu1 %v3343_v5  ;;  %1403 = vmatprep.mubr.f32.mxu1 %v3766_v7  ;;  %v2797_v5 = vld [vmem:[%s5118_s6 + $0x1f0] sm:$0xff] }
 0x2e6   : > { %3346 = vmatprep.subr.bf16.mxu1 %v3345_v11  ;;  %v3383_v11 = vpack.c.bf16 %v2802_v8, %v2800_v6 }
 0x2e8   : > { %2778 = vmatmul.mubr.msk.f32.gmra.mrb[14].mxu1 %vm1321_vm11, %v1319_v9  ;;  %v3381_v9 = vpack.c.bf16 %v2797_v5, %v2795_v4 }
 0x2e9   : > { %3348 = vmatpush1.bf16.msra.mxu1 %v3347_v18  ;;  %1484 = vmatprep.mubr.f32.mxu1 %v3766_v7  ;;  %v3387_v18 = vpack.c.bf16 %v2806_v15, %v2804_v14 }
 0x2ea   : > { %3350 = vmatprep.subr.bf16.mxu1 %v3349_v19  ;;  %v2803_v19 = vld [vmem:[%s5118_s6 + $0x220] sm:$0xff] }
 0x2eb   : > { %v3390_v21 = vpack.c.bf16 %v2805_v20, %v2803_v19 }
 0x2ed   : > { %3352 = vmatpush1.bf16.msra.mxu1 %v3351_v24  ;;  %v1840_v24 = vld [vmem:[%s5122_s10 + $0x20] sm:$0xff] }
 0x2ee   : > { %3354 = vmatprep.subr.bf16.mxu1 %v3353_v25  ;;  %v1841_v25 = vld [vmem:[%s5122_s10 + $0x28] sm:$0xff] }
 0x2ef   : > { %v3445_v26 = vpack.c.bf16 %v1841_v25, %v1840_v24  ;;  %v1739_v24 = vld [vmem:[%s5121_s9 + $0x18] sm:$0xff] }
 0x2f1   : > { %3356 = vmatpush1.bf16.msra.mxu1 %v3355_v30  ;;  %v1844_v30 = vld [vmem:[%s5122_s10 + $0x40] sm:$0xff] }
 0x2f2   : > { %3358 = vmatprep.subr.bf16.mxu1 %v3357_v33  ;;  %v1845_v33 = vld [vmem:[%s5122_s10 + $0x48] sm:$0xff] }
 0x2f3   : > { %v3451_v35 = vpack.c.bf16 %v1845_v33, %v1844_v30  ;;  %v1743_v30 = vld [vmem:[%s5121_s9 + $0x38] sm:$0xff] }
 0x2f5   : > { %3360 = vmatpush1.bf16.msra.mxu1 %v3359_v39  ;;  %v1848_v39 = vld [vmem:[%s5122_s10 + $0x60] sm:$0xff] }
 0x2f6   : > { %3363 = vmatprep.subr.msk.bf16.mxu1 %vm4283_vm10, %v3361_v40  ;;  %v1849_v40 = vld [vmem:[%s5122_s10 + $0x68] sm:$0xff] }
 0x2f7   : > { %v3457_v41 = vpack.c.bf16 %v1849_v40, %v1848_v39  ;;  %v1747_v39 = vld [vmem:[%s5121_s9 + $0x58] sm:$0xff] }
 0x2f9   : > { %3366 = vmatpush1.bf16.msk.msra.mxu1 %vm4283_vm10, %v3364_v46  ;;  %v1852_v46 = vld [vmem:[%s5122_s10 + $0x80] sm:$0xff] }
 0x2fa   : > { %3368 = vmatprep.subr.bf16.mxu1 %v3367_v47  ;;  %v1853_v47 = vld [vmem:[%s5122_s10 + $0x88] sm:$0xff] }
 0x2fb   : > { %v3463_v48 = vpack.c.bf16 %v1853_v47, %v1852_v46  ;;  %v1751_v46 = vld [vmem:[%s5121_s9 + $0x78] sm:$0xff] }
 0x2fc   : > { %2781 = vmatmul.mubr.msk.f32.vlgmr.msra.gmra.mrb[12].mxu1 %vm1321_vm11, %v4309_v57  ;;  %v2798_v57 = vld [vmem:[%s5118_s6 + $0x1f8] sm:$0xff] }
 0x2fd   : > { %3370 = vmatpush1.bf16.msra.mxu1 %v3369_v52  ;;  %1490 = vmatprep.mubr.f32.mxu1 %v3766_v7  ;;  %v3379_v3 = vpack.c.bf16 %v2798_v57, %v2796_v1  ;;  %v1856_v52 = vld [vmem:[%s5122_s10 + $0xa0] sm:$0xff] }
 0x2fe   : > { %3372 = vmatprep.subr.bf16.mxu1 %v3371_v53  ;;  %v1857_v53 = vld [vmem:[%s5122_s10 + $0xa8] sm:$0xff] }
 0x2ff   : > { %v3469_v54 = vpack.c.bf16 %v1857_v53, %v1856_v52  ;;  %v1755_v52 = vld [vmem:[%s5121_s9 + $0x98] sm:$0xff] }
 0x300   : > { %2782 = vmatmul.mubr.msk.f32.gmra.mrb[14].mxu1 %vm1321_vm11, %v4317_v0  ;;  %v1839_v0 = vld [vmem:[%s5122_s10 + $0x18] sm:$0xff] }
 0x301   : > { %3374 = vmatpush1.bf16.msra.mxu1 %v3373_v60  ;;  %1599 = vmatprep.mubr.f32.mxu1 %v3766_v7  ;;  %v1616_v60 = vld [vmem:[%s5119_s7] sm:$0x3] }
 0x302   : > { %3376 = vmatprep.subr.bf16.mxu1 %v3375_v61  ;;  %v1621_v61 = vrot.slane %v1616_v60, %v900_v32  ;;  %v1625_v62 = vrot.slane %v1616_v60, %v904_v34  ;;  %v1759_v60 = vld [vmem:[%s5121_s9 + $0xb8] sm:$0xff] }
 0x305   : > { %3378 = vmatpush1.bf16.msra.mxu1 %v3377_v2 }
 0x306   : > { %3380 = vmatprep.subr.bf16.mxu1 %v3379_v3 }
 0x309   : > { %3382 = vmatpush1.bf16.msra.mxu1 %v3381_v9 }
 0x30a   : > { %3384 = vmatprep.subr.bf16.mxu1 %v3383_v11 }
 0x30d   : > { %3386 = vmatpush1.bf16.msra.mxu1 %v3385_v16 }
 0x30e   : > { %3389 = vmatprep.subr.msk.bf16.mxu1 %vm4283_vm10, %v3387_v18 }
 0x311   : > { %3392 = vmatpush1.bf16.msk.msra.mxu1 %vm4283_vm10, %v3390_v21 }
 0x312   : > { %3438 = vmatprep.subr.bf16.mxu1 %v3767_v56 }
 0x314   : > { %2809 = vmatmul.mubr.msk.f32.vlgmr.msra.gmra.mrb[12].mxu1 %vm1321_vm11, %v4345_v17  ;;  %v1838_v17 = vld [vmem:[%s5122_s10 + $0x10] sm:$0xff] }
 0x315   : > { %1605 = vmatprep.mubr.f32.mxu1 %v3766_v7  ;;  %3440 = vmatpush1.bf16.msra.mxu1 %v3439_v23  ;;  %v1737_v23 = vld [vmem:[%s5121_s9 + $0x8] sm:$0xff] }
 0x316   : > { %3441 = vmatprep.subr.bf16.mxu1 %v3767_v56 }
 0x318   : > { %2810 = vmatmul.mubr.msk.f32.gmra.mrb[14].mxu1 %vm1321_vm11, %v1523_v10  ;;  %v3442_v10 = vpack.c.bf16 %v1839_v0, %v1838_v17  ;;  %v1654_v17 = vld [vmem:[%s5120_s8] sm:$0x3f]  ;;  %v3400_v0 = vpack.c.bf16 %v1737_v23, %v1736_v44  ;;  %v2823_v23 = vld [vmem:[%s5123_s11 + $0x90] sm:$0xff] }
 0x31a   : > { %3443 = vmatpush1.bf16.msra.mxu1 %v3442_v10  ;;  %v1738_v10 = vld [vmem:[%s5121_s9 + $0x10] sm:$0xff] }
 0x31b   : > { %3444 = vmatprep.subr.bf16.mxu1 %v3767_v56  ;;  %v3403_v25 = vpack.c.bf16 %v1739_v24, %v1738_v10  ;;  %v1941_v10 = vld [vmem:[%s5123_s11 + $0x38] sm:$0xff] }
 0x31e   : > { %3446 = vmatpush1.bf16.msra.mxu1 %v3445_v26  ;;  %v1740_v26 = vld [vmem:[%s5121_s9 + $0x20] sm:$0xff] }
 0x31f   : > { %3447 = vmatprep.subr.bf16.mxu1 %v3767_v56  ;;  %v3406_v28 = vpack.c.bf16 %v1741_v27, %v1740_v26  ;;  %v2825_v26 = vld [vmem:[%s5123_s11 + $0xa0] sm:$0xff]  ;;  %v2826_v27 = vld [vmem:[%s5123_s11 + $0xa8] sm:$0xff] }
 0x322   : > { %3449 = vmatpush1.bf16.msra.mxu1 %v3448_v29  ;;  %v1742_v29 = vld [vmem:[%s5121_s9 + $0x30] sm:$0xff] }
 0x323   : > { %3450 = vmatprep.subr.bf16.mxu1 %v3767_v56  ;;  %v3409_v33 = vpack.c.bf16 %v1743_v30, %v1742_v29  ;;  %v1943_v29 = vld [vmem:[%s5123_s11 + $0x48] sm:$0xff]  ;;  %v3508_v30 = vpack.c.bf16 %v2826_v27, %v2825_v26  ;;  %v2860_v26 = vld [vmem:[%s5123_s11 + $0x1a0] sm:$0xff] }
 0x324   : > { %v2861_v27 = vld [vmem:[%s5123_s11 + $0x1a8] sm:$0xff] }
 0x326   : > { %3452 = vmatpush1.bf16.msra.mxu1 %v3451_v35  ;;  %v1744_v35 = vld [vmem:[%s5121_s9 + $0x40] sm:$0xff] }
 0x327   : > { %3453 = vmatprep.subr.bf16.mxu1 %v3767_v56  ;;  %v3412_v37 = vpack.c.bf16 %v1745_v36, %v1744_v35  ;;  %v1944_v35 = vld [vmem:[%s5123_s11 + $0x50] sm:$0xff]  ;;  %v1945_v36 = vld [vmem:[%s5123_s11 + $0x58] sm:$0xff] }
 0x32a   : > { %3455 = vmatpush1.bf16.msra.mxu1 %v3454_v38  ;;  %v1746_v38 = vld [vmem:[%s5121_s9 + $0x50] sm:$0xff] }
 0x32b   : > { %3456 = vmatprep.subr.bf16.mxu1 %v3767_v56  ;;  %v3415_v40 = vpack.c.bf16 %v1747_v39, %v1746_v38  ;;  %v2828_v38 = vld [vmem:[%s5123_s11 + $0xb8] sm:$0xff]  ;;  %v3493_v39 = vpack.c.bf16 %v1945_v36, %v1944_v35  ;;  %v2864_v35 = vld [vmem:[%s5123_s11 + $0x1c0] sm:$0xff]  ;;  %v2865_v36 = vld [vmem:[%s5123_s11 + $0x1c8] sm:$0xff] }
 0x32e   : > { %3458 = vmatpush1.bf16.msra.mxu1 %v3457_v41  ;;  %v1748_v41 = vld [vmem:[%s5121_s9 + $0x60] sm:$0xff] }
 0x32f   : > { %3459 = vmatprep.subr.bf16.mxu1 %v3767_v56  ;;  %v3418_v43 = vpack.c.bf16 %v1749_v42, %v1748_v41  ;;  %v2830_v41 = vld [vmem:[%s5123_s11 + $0xc0] sm:$0xff]  ;;  %v2831_v42 = vld [vmem:[%s5123_s11 + $0xc8] sm:$0xff] }
 0x332   : > { %3461 = vmatpush1.bf16.msra.mxu1 %v3460_v45  ;;  %v1750_v45 = vld [vmem:[%s5121_s9 + $0x70] sm:$0xff] }
 0x333   : > { %3462 = vmatprep.subr.bf16.mxu1 %v3767_v56  ;;  %v3421_v47 = vpack.c.bf16 %v1751_v46, %v1750_v45 }
 0x336   : > { %3464 = vmatpush1.bf16.msra.mxu1 %v3463_v48  ;;  %v1752_v48 = vld [vmem:[%s5121_s9 + $0x80] sm:$0xff] }
 0x337   : > { %3465 = vmatprep.subr.bf16.mxu1 %v3767_v56  ;;  %v3424_v50 = vpack.c.bf16 %v1753_v49, %v1752_v48  ;;  %v3514_v49 = vpack.c.bf16 %v2831_v42, %v2830_v41  ;;  %v2869_v41 = vld [vmem:[%s5123_s11 + $0x1e0] sm:$0xff]  ;;  %v2870_v42 = vld [vmem:[%s5123_s11 + $0x1e8] sm:$0xff] }
 0x33a   : > { %3467 = vmatpush1.bf16.msra.mxu1 %v3466_v51  ;;  %v1754_v51 = vld [vmem:[%s5121_s9 + $0x90] sm:$0xff] }
 0x33b   : > { %3468 = vmatprep.subr.bf16.mxu1 %v3767_v56  ;;  %v3427_v53 = vpack.c.bf16 %v1755_v52, %v1754_v51  ;;  %v2832_v51 = vld [vmem:[%s5123_s11 + $0xd0] sm:$0xff]  ;;  %v2833_v52 = vld [vmem:[%s5123_s11 + $0xd8] sm:$0xff] }
 0x33e   : > { %3470 = vmatpush1.bf16.msra.mxu1 %v3469_v54  ;;  %v1756_v54 = vld [vmem:[%s5121_s9 + $0xa0] sm:$0xff] }
 0x33f   : > { %3471 = vmatprep.subr.bf16.mxu1 %v3767_v56  ;;  %v3430_v58 = vpack.c.bf16 %v1757_v55, %v1756_v54  ;;  %v2834_v54 = vld [vmem:[%s5123_s11 + $0xe0] sm:$0xff]  ;;  %v2835_v55 = vld [vmem:[%s5123_s11 + $0xe8] sm:$0xff] }
 0x342   : > { %3473 = vmatpush1.bf16.msra.mxu1 %v3472_v59  ;;  %v1758_v59 = vld [vmem:[%s5121_s9 + $0xb0] sm:$0xff] }
 0x343   : > { %3474 = vmatprep.subr.bf16.mxu1 %v3767_v56 }
 0x3e7   : > { %v1601_v63 = vpop.f32.mrb[12].mxu1 }
 0x3e8   : > { %v1628_v1 = vadd.f32 %v1621_v61, %v1601_v63  ;;  %v1603_v57 = vpop.f32.mrb[13].mxu1  ;;  %v1761_v63 = vld [vmem:[%s5121_s9 + $0xc8] sm:$0xff] }
 0x3e9   : > { %v1629_v2 = vadd.f32 %v1625_v62, %v1603_v57 }
 0x3ea   : > { %v1632_v4 = vmax.f32 %v1628_v1, 0.0  ;;  %v1860_v1 = vld [vmem:[%s5122_s10 + $0xc0] sm:$0xff] }
 0x3eb   : > { %v1607_v3 = vpop.f32.mrb[14].mxu1  ;;  %v1633_v8 = vmax.f32 %v1629_v2, 0.0  ;;  %v1861_v2 = vld [vmem:[%s5122_s10 + $0xc8] sm:$0xff] }
 0x3ec   : > { %v1630_v5 = vadd.f32 %v1621_v61, %v1607_v3  ;;  %v1609_v6 = vpop.f32.mrb[15].mxu1  ;;  %v1640_v13 = vrot.slane %v1632_v4, 1  ;;  %v3433_v61 = vpack.c.bf16 %v1759_v60, %v1758_v59  ;;  %v3475_v3 = vpack.c.bf16 %v1861_v2, %v1860_v1  ;;  %v2836_v59 = vld [vmem:[%s5123_s11 + $0xf0] sm:$0xff]  ;;  %v2837_v60 = vld [vmem:[%s5123_s11 + $0xf8] sm:$0xff] }
 0x3ed   : > { %v1631_v9 = vadd.f32 %v1625_v62, %v1609_v6  ;;  %v1643_v15 = vrot.slane %v1633_v8, 1  ;;  %v1760_v62 = vld [vmem:[%s5121_s9 + $0xc0] sm:$0xff]  ;;  %v2841_v2 = vld [vmem:[%s5123_s11 + $0x118] sm:$0xff] }
 0x3ee   : > { %v1634_v11 = vmax.f32 %v1630_v5, 0.0  ;;  %v3436_v57 = vpack.c.bf16 %v1761_v63, %v1760_v62  ;;  %3476 = vmatpush1.bf16.msra.mxu1 %v3475_v3  ;;  %v2818_v5 = vld [vmem:[%s5123_s11 + $0x68] sm:$0xff]  ;;  %v1934_v6 = vld [vmem:[%s5123_s11] sm:$0xff] }
 0x3ef   : > { %v1635_v12 = vmax.f32 %v1631_v9, 0.0  ;;  %3477 = vmatprep.subr.bf16.mxu1 %v3767_v56  ;;  %v2838_v62 = vld [vmem:[%s5123_s11 + $0x100] sm:$0xff]  ;;  %v2839_v63 = vld [vmem:[%s5123_s11 + $0x108] sm:$0xff] }
 0x3f0   : > { %v1641_v14 = vrot.slane %v1634_v11, 1  ;;  %v3526_v1 = vpack.c.bf16 %v2839_v63, %v2838_v62  ;;  %v2459_v62 = vld [vmem:[%s5125_s13 + $0x10] sm:$0xff] }
 0x3f1   : > { %v1644_v16 = vrot.slane %v1635_v12, 1 }
 0x3f2   : > { %v1642_v32 = vsel %vm571_vm0, %v1640_v13, %v1641_v14  ;;  %v1652_v31 = vmax.f32 %v1634_v11, %v1641_v14  ;;  %v2819_v13 = vld [vmem:[%s5123_s11 + $0x70] sm:$0xff] }
 0x3f3   : > { %v1650_v34 = vmax.f32 %v1632_v4, %v1642_v32  ;;  %v1645_v18 = vsel %vm571_vm0, %v1643_v15, %v1644_v16  ;;  %v1653_v19 = vmax.f32 %v1635_v12, %v1644_v16  ;;  %v2817_v4 = vld [vmem:[%s5123_s11 + $0x60] sm:$0xff]  ;;  %v2820_v15 = vld [vmem:[%s5123_s11 + $0x78] sm:$0xff]  ;;  %v1936_v16 = vld [vmem:[%s5123_s11 + $0x10] sm:$0xff]  ;;  %vm1946_vm0 = vcmask 785408  }
 0x3f4   : > { %v1651_v20 = vmax.f32 %v1633_v8, %v1645_v18  ;;  %v1935_v8 = vld [vmem:[%s5123_s11 + $0x8] sm:$0xff]  ;;  %v3496_v11 = vpack.c.bf16 %v2818_v5, %v2817_v4  ;;  %v1937_v32 = vld [vmem:[%s5123_s11 + $0x18] sm:$0xff]  ;;  %v2821_v18 = vld [vmem:[%s5123_s11 + $0x80] sm:$0xff] }
 0x3f5   : > { %v3396_v21 = vpack.c.bf16 %v1652_v31, %v1650_v34  ;;  %v3478_v12 = vpack.c.bf16 %v1935_v8, %v1934_v6  ;;  %v3499_v31 = vpack.c.bf16 %v2820_v15, %v2819_v13  ;;  %v3481_v34 = vpack.c.bf16 %v1937_v32, %v1936_v16  ;;  %v2843_v4 = vld [vmem:[%s5123_s11 + $0x120] sm:$0xff]  ;;  %v2844_v5 = vld [vmem:[%s5123_s11 + $0x128] sm:$0xff]  ;;  %v2849_v16 = vld [vmem:[%s5123_s11 + $0x150] sm:$0xff] }
 0x3f6   : > { %v3393_v22 = vpack.c.bf16 %v1653_v19, %v1651_v20  ;;  %v2822_v19 = vld [vmem:[%s5123_s11 + $0x88] sm:$0xff]  ;;  %v1938_v20 = vld [vmem:[%s5123_s11 + $0x20] sm:$0xff]  ;;  %v3532_v6 = vpack.c.bf16 %v2844_v5, %v2843_v4  ;;  %v2850_v32 = vld [vmem:[%s5123_s11 + $0x158] sm:$0xff] }
 0x3f7   : > { %v2847_v13 = vld [vmem:[%s5123_s11 + $0x140] sm:$0xff]  ;;  %v2880_v4 = vld [vmem:[%s5123_s11 + $0x238] sm:$0xff] }
 0x3f8   : > { %3395 = vmatprep.subr.msk.bf16.mxu0 %vm3394_vm12, %v3393_v22  ;;  %v3502_v22 = vpack.c.bf16 %v2822_v19, %v2821_v18  ;;  %v2852_v18 = vld [vmem:[%s5123_s11 + $0x168] sm:$0xff]  ;;  %v2461_v5 = vld [vmem:[%s5125_s13 + $0x20] sm:$0xff] }
 0x3f9   : > { %3398 = vmatpush1.bf16.msk.msra.mxu0 %vm3394_vm12, %v3396_v21  ;;  %v1939_v21 = vld [vmem:[%s5123_s11 + $0x28] sm:$0xff] }
 0x3fa   : > { %3399 = vmatprep.subr.bf16.mxu0 %v3767_v56  ;;  %v3484_v44 = vpack.c.bf16 %v1939_v21, %v1938_v20  ;;  %v2853_v20 = vld [vmem:[%s5123_s11 + $0x170] sm:$0xff]  ;;  %v2854_v21 = vld [vmem:[%s5123_s11 + $0x178] sm:$0xff] }
 0x3fc   : > { %2813 = vmatmul.mubr.msk.f32.vlgmr.msra.gmra.mrb[12].mxu0 %vm1655_vm13, %v1654_v17  ;;  %v2824_v17 = vld [vmem:[%s5123_s11 + $0x98] sm:$0xff] }
 0x3fd   : > { %3401 = vmatpush1.bf16.msra.mxu0 %v3400_v0  ;;  %v1940_v0 = vld [vmem:[%s5123_s11 + $0x30] sm:$0xff]  ;;  %v3505_v24 = vpack.c.bf16 %v2824_v17, %v2823_v23  ;;  %v2857_v23 = vld [vmem:[%s5123_s11 + $0x188] sm:$0xff] }
 0x3fe   : > { %3402 = vmatprep.subr.bf16.mxu0 %v3767_v56 }
 0x401   : > { %3404 = vmatpush1.bf16.msra.mxu0 %v3403_v25  ;;  %v3487_v25 = vpack.c.bf16 %v1941_v10, %v1940_v0  ;;  %v2858_v10 = vld [vmem:[%s5123_s11 + $0x190] sm:$0xff] }
 0x402   : > { %3405 = vmatprep.subr.bf16.mxu0 %v3767_v56 }
 0x405   : > { %3407 = vmatpush1.bf16.msra.mxu0 %v3406_v28  ;;  %v1942_v28 = vld [vmem:[%s5123_s11 + $0x40] sm:$0xff] }
 0x406   : > { %3408 = vmatprep.subr.bf16.mxu0 %v3767_v56 }
 0x409   : > { %3410 = vmatpush1.bf16.msra.mxu0 %v3409_v33  ;;  %v3490_v33 = vpack.c.bf16 %v1943_v29, %v1942_v28  ;;  %v3556_v28 = vpack.c.bf16 %v2861_v27, %v2860_v26  ;;  %v2862_v29 = vld [vmem:[%s5123_s11 + $0x1b0] sm:$0xff] }
 0x40a   : > { %3411 = vmatprep.subr.bf16.mxu0 %v3767_v56 }
 0x40d   : > { %3413 = vmatpush1.bf16.msra.mxu0 %v3412_v37  ;;  %v2827_v37 = vld [vmem:[%s5123_s11 + $0xb0] sm:$0xff] }
 0x40e   : > { %3414 = vmatprep.subr.bf16.mxu0 %v3767_v56 }
 0x411   : > { %3416 = vmatpush1.bf16.msra.mxu0 %v3415_v40  ;;  %v3511_v40 = vpack.c.bf16 %v2828_v38, %v2827_v37  ;;  %v3562_v37 = vpack.c.bf16 %v2865_v36, %v2864_v35  ;;  %v2866_v38 = vld [vmem:[%s5123_s11 + $0x1d0] sm:$0xff]  ;;  %v2552_v35 = vld [vmem:[%s5127_s15 + $0x20] sm:$0xff]  ;;  %v2553_v36 = vld [vmem:[%s5127_s15 + $0x28] sm:$0xff] }
 0x412   : > { %3417 = vmatprep.subr.bf16.mxu0 %v3767_v56 }
 0x415   : > { %3419 = vmatpush1.bf16.msra.mxu0 %v3418_v43 }
 0x416   : > { %3420 = vmatprep.subr.bf16.mxu0 %v3767_v56 }
 0x419   : > { %3422 = vmatpush1.bf16.msra.mxu0 %v3421_v47 }
 0x41a   : > { %3423 = vmatprep.subr.bf16.mxu0 %v3767_v56 }
 0x41d   : > { %3425 = vmatpush1.bf16.msra.mxu0 %v3424_v50 }
 0x41e   : > { %3426 = vmatprep.subr.bf16.mxu0 %v3767_v56 }
 0x421   : > { %3428 = vmatpush1.bf16.msra.mxu0 %v3427_v53  ;;  %v3517_v53 = vpack.c.bf16 %v2833_v52, %v2832_v51  ;;  %v2874_v51 = vld [vmem:[%s5123_s11 + $0x208] sm:$0xff] }
 0x422   : > { %3429 = vmatprep.subr.bf16.mxu0 %v3767_v56 }
 0x425   : > { %3431 = vmatpush1.bf16.msra.mxu0 %v3430_v58  ;;  %v3520_v58 = vpack.c.bf16 %v2835_v55, %v2834_v54  ;;  %v2876_v54 = vld [vmem:[%s5123_s11 + $0x218] sm:$0xff] }
 0x426   : > { %3432 = vmatprep.subr.bf16.mxu0 %v3767_v56 }
 0x429   : > { %3434 = vmatpush1.bf16.msra.mxu0 %v3433_v61  ;;  %v3523_v61 = vpack.c.bf16 %v2837_v60, %v2836_v59  ;;  %v2878_v59 = vld [vmem:[%s5123_s11 + $0x228] sm:$0xff]  ;;  %v2457_v60 = vld [vmem:[%s5125_s13] sm:$0xff] }
 0x42a   : > { %3435 = vmatprep.subr.bf16.mxu0 %v3767_v56 }
 0x42d   : > { %3437 = vmatpush1.bf16.msra.mxu0 %v3436_v57  ;;  %v2840_v57 = vld [vmem:[%s5123_s11 + $0x110] sm:$0xff] }
 0x42e   : > { %3495 = vmatprep.subr.bf16.mxu0 %v3767_v56  ;;  %v3529_v3 = vpack.c.bf16 %v2841_v2, %v2840_v57  ;;  %v2879_v2 = vld [vmem:[%s5123_s11 + $0x230] sm:$0xff] }
 0x4cf   : > { %v1731_v9 = vpop.f32.mrb[12].mxu0 }
 0x4d0   : > { %v1733_v14 = vpop.f32.mrb[13].mxu0 }
 0x4d1   : > { %2814 = vmatprep.mubr.msk.f32.mxu0 %vm1762_vm14, %v1733_v14  ;;  %2815 = vmatprep.mubr.msk.f32.mxu1 %vm1762_vm14, %v1733_v14  ;;  %v2848_v14 = vld [vmem:[%s5123_s11 + $0x148] sm:$0xff] }
 0x4d2   : > { %1831 = vmatmul.mubr.f32.vlgmr.msra.gmra.mrb[14].mxu0 %v1731_v9  ;;  %1927 = vmatmul.mubr.f32.vlgmr.msra.gmra.mrb[16].mxu1 %v1731_v9  ;;  %v2845_v9 = vld [vmem:[%s5123_s11 + $0x130] sm:$0xff]  ;;  %v3538_v15 = vpack.c.bf16 %v2848_v14, %v2847_v13 }
 0x4d3   : > { %3497 = vmatpush3.bf16.msra.mxu0 %v3496_v11  ;;  %3479 = vmatpush3.bf16.msra.mxu1 %v3478_v12  ;;  %v2846_v11 = vld [vmem:[%s5123_s11 + $0x138] sm:$0xff] }
 0x4d4   : > { %3498 = vmatprep.subr.bf16.mxu0 %v3767_v56  ;;  %3480 = vmatprep.subr.bf16.mxu1 %v3767_v56  ;;  %v3535_v12 = vpack.c.bf16 %v2846_v11, %v2845_v9  ;;  %v2463_v11 = vld [vmem:[%s5125_s13 + $0x30] sm:$0xff] }
 0x4d5   : > { %3019 = vmatprep.mubr.msk.f32.mxu1 %vm3769_vm15, %v3766_v7  ;;  %3046 = vmatprep.mubr.msk.f32.mxu0 %vm3769_vm15, %v3766_v7 }
 0x4d7   : > { %3500 = vmatpush3.bf16.msra.mxu0 %v3499_v31  ;;  %3482 = vmatpush3.bf16.msra.mxu1 %v3481_v34  ;;  %v3541_v31 = vpack.c.bf16 %v2850_v32, %v2849_v16  ;;  %v2851_v34 = vld [vmem:[%s5123_s11 + $0x160] sm:$0xff]  ;;  %v2466_v16 = vld [vmem:[%s5125_s13 + $0x48] sm:$0xff] }
 0x4d8   : > { %3501 = vmatprep.subr.bf16.mxu0 %v3767_v56  ;;  %3483 = vmatprep.subr.bf16.mxu1 %v3767_v56  ;;  %v3544_v19 = vpack.c.bf16 %v2852_v18, %v2851_v34  ;;  %v2469_v18 = vld [vmem:[%s5125_s13 + $0x60] sm:$0xff] }
 0x4db   : > { %3503 = vmatpush3.bf16.msra.mxu0 %v3502_v22  ;;  %3485 = vmatpush3.bf16.msra.mxu1 %v3484_v44  ;;  %v3547_v22 = vpack.c.bf16 %v2854_v21, %v2853_v20  ;;  %v2856_v44 = vld [vmem:[%s5123_s11 + $0x180] sm:$0xff]  ;;  %v2471_v21 = vld [vmem:[%s5125_s13 + $0x70] sm:$0xff] }
 0x4dc   : > { %3504 = vmatprep.subr.bf16.mxu0 %v3767_v56  ;;  %3486 = vmatprep.subr.bf16.mxu1 %v3767_v56  ;;  %v3550_v17 = vpack.c.bf16 %v2857_v23, %v2856_v44  ;;  %v1933_v23 = vld [vmem:[%s5124_s12] sm:$0x1] }
 0x4df   : > { %3506 = vmatpush3.bf16.msra.mxu0 %v3505_v24  ;;  %3488 = vmatpush3.bf16.msra.mxu1 %v3487_v25  ;;  %v2859_v24 = vld [vmem:[%s5123_s11 + $0x198] sm:$0xff] }
 0x4e0   : > { %3507 = vmatprep.subr.bf16.mxu0 %v3767_v56  ;;  %3489 = vmatprep.subr.bf16.mxu1 %v3767_v56  ;;  %v3553_v25 = vpack.c.bf16 %v2859_v24, %v2858_v10  ;;  %v2549_v10 = vld [vmem:[%s5127_s15 + $0x8] sm:$0xff] }
 0x4e3   : > { %3509 = vmatpush3.bf16.msra.mxu0 %v3508_v30  ;;  %3491 = vmatpush3.bf16.msra.mxu1 %v3490_v33  ;;  %v2863_v30 = vld [vmem:[%s5123_s11 + $0x1b8] sm:$0xff] }
 0x4e4   : > { %3510 = vmatprep.subr.bf16.mxu0 %v3767_v56  ;;  %3492 = vmatprep.subr.bf16.mxu1 %v3767_v56  ;;  %v3559_v33 = vpack.c.bf16 %v2863_v30, %v2862_v29  ;;  %v2550_v29 = vld [vmem:[%s5127_s15 + $0x10] sm:$0xff]  ;;  %v2551_v30 = vld [vmem:[%s5127_s15 + $0x18] sm:$0xff] }
 0x4e7   : > { %3494 = vmatpush3.bf16.msra.mxu1 %v3493_v39  ;;  %3512 = vmatpush3.bf16.msra.mxu0 %v3511_v40  ;;  %v2867_v39 = vld [vmem:[%s5123_s11 + $0x1d8] sm:$0xff] }
 0x4e8   : > { %3585 = vmatprep.subr.bf16.mxu1 %v3767_v56  ;;  %3513 = vmatprep.subr.bf16.mxu0 %v3767_v56  ;;  %v3565_v40 = vpack.c.bf16 %v2867_v39, %v2866_v38  ;;  %v2554_v38 = vld [vmem:[%s5127_s15 + $0x30] sm:$0xff]  ;;  %v2555_v39 = vld [vmem:[%s5127_s15 + $0x38] sm:$0xff] }
 0x5a5   : > { %v1832_v43 = vpop.f32.mrb[14].mxu0  ;;  %v1928_v45 = vpop.f32.mrb[16].mxu1 }
 0x5a6   : > { %v4777_v46 = vmax.f32 %v1832_v43, %v1928_v45  ;;  %v1834_v47 = vpop.f32.mrb[15].mxu0  ;;  %v1930_v48 = vpop.f32.mrb[17].mxu1  ;;  %v3568_v43 = vpack.c.bf16 %v2870_v42, %v2869_v41  ;;  %v2556_v41 = vld [vmem:[%s5127_s15 + $0x40] sm:$0xff]  ;;  %v2557_v42 = vld [vmem:[%s5127_s15 + $0x48] sm:$0xff] }
 0x5a7   : > { %v2871_v47 = vld [vmem:[%s5123_s11 + $0x1f0] sm:$0xff]  ;;  %v2872_v48 = vld [vmem:[%s5123_s11 + $0x1f8] sm:$0xff] }
 0x5a8   : > { %3020 = vmatmul.mubr.msk.f32.vlgmr.msra.gmra.mrb[18].mxu1 %vm1946_vm0, %v4777_v46  ;;  %v2034_v50 = vrot.slane %v4777_v46, 1  ;;  %v2121_v8 = vrot.slane %v4777_v46, 2  ;;  %v2208_v0 = vrot.slane %v4777_v46, 3  ;;  %v2295_v45 = vrot.slane %v4777_v46, 4 }
 0x5a9   : > { %3187 = vmatprep.mubr.msk.f32.mxu1 %vm3769_vm15, %v3766_v7  ;;  %v2382_v14 = vrot.slane %v4777_v46, 5  ;;  %v2467_v46 = vld [vmem:[%s5125_s13 + $0x50] sm:$0xff] }
 0x5aa   : > { %3047 = vmatmul.mubr.msk.f32.vlgmr.msra.gmra.mrb[16].mxu0 %vm1946_vm0, %v2034_v50  ;;  %v2873_v50 = vld [vmem:[%s5123_s11 + $0x200] sm:$0xff] }
 0x5ab   : > { %3515 = vmatpush3.bf16.msra.mxu0 %v3514_v49  ;;  %3073 = vmatprep.mubr.msk.f32.mxu0 %vm3769_vm15, %v3766_v7  ;;  %v3571_v49 = vpack.c.bf16 %v2872_v48, %v2871_v47  ;;  %v3574_v52 = vpack.c.bf16 %v2874_v51, %v2873_v50 }
 0x5ac   : > { %3516 = vmatprep.subr.bf16.mxu0 %v3767_v56 }
 0x5af   : > { %3518 = vmatpush3.bf16.msra.mxu0 %v3517_v53  ;;  %v2875_v53 = vld [vmem:[%s5123_s11 + $0x210] sm:$0xff] }
 0x5b0   : > { %3519 = vmatprep.subr.bf16.mxu0 %v3767_v56  ;;  %v3577_v55 = vpack.c.bf16 %v2876_v54, %v2875_v53 }
 0x5b3   : > { %3521 = vmatpush3.bf16.msra.mxu0 %v3520_v58  ;;  %v2877_v58 = vld [vmem:[%s5123_s11 + $0x220] sm:$0xff] }
 0x5b4   : > { %3522 = vmatprep.subr.bf16.mxu0 %v3767_v56  ;;  %v3580_v57 = vpack.c.bf16 %v2878_v59, %v2877_v58 }
 0x5b7   : > { %3524 = vmatpush3.bf16.msra.mxu0 %v3523_v61  ;;  %v2458_v61 = vld [vmem:[%s5125_s13 + $0x8] sm:$0xff] }
 0x5b8   : > { %3525 = vmatprep.subr.bf16.mxu0 %v3767_v56  ;;  %v3586_v63 = vpack.c.bf16 %v2458_v61, %v2457_v60 }
 0x5ba   : > { %3587 = vmatpush3.bf16.msra.mxu1 %v3586_v63 }
 0x5bb   : > { %3527 = vmatpush3.bf16.msra.mxu0 %v3526_v1  ;;  %v2460_v1 = vld [vmem:[%s5125_s13 + $0x18] sm:$0xff]  ;;  %3588 = vmatprep.subr.bf16.mxu1 %v3767_v56 }
 0x5bc   : > { %3528 = vmatprep.subr.bf16.mxu0 %v3767_v56 }
 0x5bf   : > { %3530 = vmatpush3.bf16.msra.mxu0 %v3529_v3  ;;  %v3589_v3 = vpack.c.bf16 %v2460_v1, %v2459_v62 }
 0x5c0   : > { %3531 = vmatprep.subr.bf16.mxu0 %v3767_v56 }
 0x5c1   : > { %3590 = vmatpush3.bf16.msra.mxu1 %v3589_v3 }
 0x5c2   : > { %3074 = vmatmul.mubr.msk.f32.vlgmr.msra.gmra.mrb[16].mxu0 %vm1946_vm0, %v2121_v8  ;;  %v3583_v8 = vpack.c.bf16 %v2880_v4, %v2879_v2  ;;  %3591 = vmatprep.subr.bf16.mxu1 %v3767_v56 }
 0x5c3   : > { %3533 = vmatpush3.bf16.msra.mxu0 %v3532_v6  ;;  %3100 = vmatprep.mubr.msk.f32.mxu0 %vm3769_vm15, %v3766_v7  ;;  %v2462_v6 = vld [vmem:[%s5125_s13 + $0x28] sm:$0xff] }
 0x5c4   : > { %3534 = vmatprep.subr.bf16.mxu0 %v3767_v56  ;;  %v3592_v9 = vpack.c.bf16 %v2462_v6, %v2461_v5 }
 0x5c6   : > { %3593 = vmatpush3.bf16.msra.mxu1 %v3592_v9 }
 0x5c7   : > { %3536 = vmatpush3.bf16.msra.mxu0 %v3535_v12  ;;  %v2464_v12 = vld [vmem:[%s5125_s13 + $0x38] sm:$0xff]  ;;  %3594 = vmatprep.subr.bf16.mxu1 %v3767_v56 }
 0x5c8   : > { %3537 = vmatprep.subr.bf16.mxu0 %v3767_v56  ;;  %v3595_v13 = vpack.c.bf16 %v2464_v12, %v2463_v11 }
 0x5ca   : > { %3596 = vmatpush3.bf16.msra.mxu1 %v3595_v13 }
 0x5cb   : > { %3539 = vmatpush3.bf16.msra.mxu0 %v3538_v15  ;;  %v2465_v15 = vld [vmem:[%s5125_s13 + $0x40] sm:$0xff]  ;;  %3597 = vmatprep.subr.bf16.mxu1 %v3767_v56 }
 0x5cc   : > { %3540 = vmatprep.subr.bf16.mxu0 %v3767_v56  ;;  %v3598_v32 = vpack.c.bf16 %v2466_v16, %v2465_v15 }
 0x5ce   : > { %3599 = vmatpush3.bf16.msra.mxu1 %v3598_v32 }
 0x5cf   : > { %3542 = vmatpush3.bf16.msra.mxu0 %v3541_v31  ;;  %v2468_v31 = vld [vmem:[%s5125_s13 + $0x58] sm:$0xff]  ;;  %3600 = vmatprep.subr.bf16.mxu1 %v3767_v56 }
 0x5d0   : > { %3543 = vmatprep.subr.bf16.mxu0 %v3767_v56  ;;  %v3601_v34 = vpack.c.bf16 %v2468_v31, %v2467_v46 }
 0x5d2   : > { %3602 = vmatpush3.bf16.msra.mxu1 %v3601_v34 }
 0x5d3   : > { %3545 = vmatpush3.bf16.msra.mxu0 %v3544_v19  ;;  %3603 = vmatprep.subr.bf16.mxu1 %v3767_v56  ;;  %v2470_v19 = vld [vmem:[%s5125_s13 + $0x68] sm:$0xff] }
 0x5d4   : > { %3546 = vmatprep.subr.bf16.mxu0 %v3767_v56  ;;  %v3604_v20 = vpack.c.bf16 %v2470_v19, %v2469_v18 }
 0x5d6   : > { %3605 = vmatpush3.bf16.msra.mxu1 %v3604_v20 }
 0x5d7   : > { %3548 = vmatpush3.bf16.msra.mxu0 %v3547_v22  ;;  %3185 = vmatprep.subr.mxu1 %v3766_v7 }
 0x5d8   : > { %3549 = vmatprep.subr.bf16.mxu0 %v3767_v56 }
 0x5da   : > { %3101 = vmatmul.mubr.msk.f32.vlgmr.msra.gmra.mrb[16].mxu0 %vm1946_vm0, %v2208_v0  ;;  %3186 = vmatpush3.msra.mxu1 %v2471_v21  ;;  %v2548_v0 = vld [vmem:[%s5127_s15] sm:$0xff] }
 0x5db   : > { %3551 = vmatpush3.bf16.msra.mxu0 %v3550_v17  ;;  %3127 = vmatprep.mubr.msk.f32.mxu0 %vm3769_vm15, %v3766_v7  ;;  %v3607_v27 = vpack.c.bf16 %v2549_v10, %v2548_v0 }
 0x5dc   : > { %3552 = vmatprep.subr.bf16.mxu0 %v3767_v56  ;;  %3606 = vmatprep.subr.bf16.mxu1 %v3767_v56 }
 0x5df   : > { %3554 = vmatpush3.bf16.msra.mxu0 %v3553_v25 }
 0x5e0   : > { %3555 = vmatprep.subr.bf16.mxu0 %v3767_v56 }
 0x5e3   : > { %3557 = vmatpush3.bf16.msra.mxu0 %v3556_v28 }
 0x5e4   : > { %3558 = vmatprep.subr.bf16.mxu0 %v3767_v56 }
 0x5e7   : > { %3560 = vmatpush3.bf16.msra.mxu0 %v3559_v33  ;;  %v3610_v33 = vpack.c.bf16 %v2551_v30, %v2550_v29 }
 0x5e8   : > { %3561 = vmatprep.subr.bf16.mxu0 %v3767_v56 }
 0x5eb   : > { %3563 = vmatpush3.bf16.msra.mxu0 %v3562_v37  ;;  %v3613_v37 = vpack.c.bf16 %v2553_v36, %v2552_v35 }
 0x5ec   : > { %3564 = vmatprep.subr.bf16.mxu0 %v3767_v56 }
 0x5ef   : > { %3566 = vmatpush3.bf16.msra.mxu0 %v3565_v40  ;;  %v3616_v40 = vpack.c.bf16 %v2555_v39, %v2554_v38 }
 0x5f0   : > { %3567 = vmatprep.subr.bf16.mxu0 %v3767_v56 }
 0x5f2   : > { %3128 = vmatmul.mubr.msk.f32.vlgmr.msra.gmra.mrb[16].mxu0 %vm1946_vm0, %v2295_v45  ;;  %v2558_v45 = vld [vmem:[%s5127_s15 + $0x50] sm:$0xf] }
 0x5f3   : > { %3569 = vmatpush3.bf16.msra.mxu0 %v3568_v43  ;;  %3154 = vmatprep.mubr.msk.f32.mxu0 %vm3769_vm15, %v3766_v7  ;;  %v3619_v43 = vpack.c.bf16 %v2557_v42, %v2556_v41 }
 0x5f4   : > { %3570 = vmatprep.subr.bf16.mxu0 %v3767_v56 }
 0x5f7   : > { %3572 = vmatpush3.bf16.msra.mxu0 %v3571_v49 }
 0x5f8   : > { %3573 = vmatprep.subr.bf16.mxu0 %v3767_v56 }
 0x5fb   : > { %3575 = vmatpush3.bf16.msra.mxu0 %v3574_v52 }
 0x5fc   : > { %3576 = vmatprep.subr.bf16.mxu0 %v3767_v56 }
 0x5ff   : > { %3578 = vmatpush3.bf16.msra.mxu0 %v3577_v55 }
 0x600   : > { %3579 = vmatprep.subr.bf16.mxu0 %v3767_v56 }
 0x603   : > { %3581 = vmatpush3.bf16.msra.mxu0 %v3580_v57 }
 0x604   : > { %3582 = vmatprep.subr.bf16.mxu0 %v3767_v56 }
 0x607   : > { %3584 = vmatpush3.bf16.msra.mxu0 %v3583_v8 }
 0x60a   : > { %3155 = vmatmul.mubr.msk.f32.vlgmr.msra.gmra.mrb[16].mxu0 %vm1946_vm0, %v2382_v14 }
 0x67b   : > { %v2016_v22 = vpop.f32.mrb[18].mxu1 }
 0x67c   : > { %v3021_v44 = vpop.f32.mrb[19].mxu1  ;;  %v2020_v17 = vadd.f32 %v2016_v22, %v1933_v23 }
 0x6dd   : > { %v2451_v24 = vpop.f32.mrb[16].mxu0 }
 0x6de   : > { %v3630_v25 = vadd.f32 %v2451_v24, %v2020_v17  ;;  %v3156_v26 = vpop.f32.mrb[17].mxu0 }
 0x6e0   : > { %v2456_v28 = vmax.f32 %v3630_v25, 0.0 }
 0x6e2   : > { %3188 = vmatmul.mubr.msk.f32.vlgmr.msra.gmra.mrb[20].mxu1 %vm2473_vm1, %v2456_v28 }
 0x6e3   : > { %3608 = vmatpush3.bf16.msra.mxu1 %v3607_v27  ;;  %3212 = vmatprep.mubr.msk.f32.mxu1 %vm3769_vm15, %v3766_v7 }
 0x6e4   : > { %3609 = vmatprep.subr.bf16.mxu1 %v3767_v56 }
 0x6e7   : > { %3611 = vmatpush3.bf16.msra.mxu1 %v3610_v33 }
 0x6e8   : > { %3612 = vmatprep.subr.bf16.mxu1 %v3767_v56 }
 0x6eb   : > { %3614 = vmatpush3.bf16.msra.mxu1 %v3613_v37 }
 0x6ec   : > { %3615 = vmatprep.subr.bf16.mxu1 %v3767_v56 }
 0x6ef   : > { %3617 = vmatpush3.bf16.msra.mxu1 %v3616_v40 }
 0x6f0   : > { %3618 = vmatprep.subr.bf16.mxu1 %v3767_v56  ;;  %v2472_v56 = vld [vmem:[%s5126_s14] sm:$0x1] }
 0x6f3   : > { %3620 = vmatpush3.bf16.msra.mxu1 %v3619_v43 }
 0x6f4   : > { %3210 = vmatprep.subr.mxu1 %v3766_v7  ;;  %v2559_v7 = vld [vmem:[%s5154_s17] sm:$0x1] }
 0x6f7   : > { %3211 = vmatpush3.msk.msra.mxu1 %vm1085_vm7, %v2558_v45 }
 0x7b5   : > { %v2543_v47 = vpop.f32.mrb[20].mxu1 }
 0x7b6   : > { %v2544_v48 = vadd.f32 %v2543_v47, %v2472_v56  ;;  %v3189_v49 = vpop.f32.mrb[21].mxu1 }
 0x7b8   : > { %v2547_v50 = vmax.f32 %v2544_v48, 0.0 }
 0x7ba   : > { %3213 = vmatmul.mubr.msk.f32.vlgmr.msra.gmra.mrb[22].mxu1 %vm2560_vm2, %v2547_v50 }
 0x88d   : > { %v2633_v51 = vpop.f32.mrb[22].mxu1 }
 0x88e   : > { %v2634_v52 = vadd.f32 %v2633_v51, %v2559_v7  ;;  %v3214_v53 = vpop.f32.mrb[23].mxu1 }
 0x890   : > { %2638 = vst.msk [vmem:[%s540_s22] sm:$0x1] %vm2637_vm3, %v2634_v52 }
 0x891   : > { %3715 = shalt.err (!%p3712_p3)
}
 0x892   : > { %s3716_s21 = scalar_lea.hbm %s5070_s20, 16  ;;  %s3720_s22 = scalar_lea.hbm %s5155_s0, 32 }
 0x893   : > { %p3717_p4 = scmp.ne.s32.totalorder %s5070_s20, %s3716_s21  ;;  %p3721_p9 = scmp.lt.u32.totalorder %s5070_s20, %s5155_s0 }
 0x894   : > { %p3722_p10 = scmp.lt.u32.totalorder %s3720_s22, %s3716_s21  ;;  %p3724_p12 = scmp.lt.u32.totalorder %s3716_s21, %s5070_s20 }
 0x895   : > { %p3718_p7 = pnand %p3717_p4, %p3899_p5 }
 0x896   : > { %p3723_p11 = por %p3722_p10, %p3721_p9 }
 0x897   : > { %p3719_p8 = pneg %p3718_p7 }
 0x898   : > { %p3725_p13 = por %p3724_p12, %p3723_p11 }
 0x89a   : > { %p3726_p0 = pnand %p3725_p13, %p3719_p8 }
 0x89c   : > { %3729 = shalt.err (!%p3726_p0)
}
 0x89d   : > { %3659 = dma.vmem_to_hbm [thread:$0]  (%p3899_p5), %s5072_s19, 16, %s5070_s20, %s2640_s30  }
 0x89e PF: > { %s5156_s18 = sld [smem:[#allocation7_spill]]  ;;  %s5157_s28 = sld [smem:[#allocation5_spill]] }
 0x8a4   : > { %p3665_p1 = scmp.ge.s32.totalorder %s5156_s18, 2  ;;  %s2664_s16 = sand.u32 1, %s5157_s28  }
 0x8a5   : > { %s2665_s17 = scalar_lea.sflag [#allocation3], %s2664_s16 }
 0x8a6   : > { %p3662_p2 = pnand %p3665_p1, %p3903_p6 }
 0x8a8   : > { %3747 = dma.done.wait (!%p3662_p2), %s2665_s17, 16  }
 0x8a9   : > { %3749 = vsyncadd (!%p3662_p2), %s2665_s17, 4294967280  ;;  %s5159_s27 = sld [smem:[#allocation8_spill]]  ;;  %s5160_s21 = sld [smem:[#allocation6_spill]] }
 0x8aa   : > { %s5161_s26 = sld [smem:[#allocation9_spill]]  ;;  %s5162_s24 = smov %s3756_s25 }
 0x8af   : > { %p27_p3 = scmp.ge.s32.totalorder %s5159_s27, 4   ;;  %s5163_s25 = smov %s5160_s21 }
 0x8b1   :  { %29 = sbr.rel (!%p27_p3) target bundleno = 8 (0x8), region = 132 }
 0x8b8   :  { %2669 = vsyncpa [#allocation3], 1 }
 0x8b9   :  { %2671 = vsyncpa [#allocation3 + $0x1], 1 }

</bundles_post_ra>
